<compile_context>
chip_gen: v7x
topology: tpu7x:2x2x1
jax: 0.10.0
libtpu: 0.0.40
codegen_flags: <defaults>
</compile_context>

<pallas_src>
import jax
import jax.numpy as jnp
from jax.experimental import pallas as pl
from jax.experimental.pallas import tpu as pltpu


def _leaky_relu_f32(x, slope=0.1):
    return jnp.where(x > 0, x, slope * x)


def _pick_tk(F):
    """K-tile for the conv1 contraction axis (<= 1024, divides F)."""
    if F <= 1024:
        return F
    for cand in (1024, 512, 256, 128):
        if F % cand == 0:
            return cand
    return F


# ---------------------------------------------------------------------------
# Kernel
# ---------------------------------------------------------------------------
def head_kernel(x_ref, wc_ref, w1_ref, w2_ref, w3_ref, b_ref, o_ref, acc_ref):
    k = pl.program_id(0)

    # Partial 1x1 conv (== matmul) for this contiguous K-slab of conv1's
    # [in, out] weight: [B, tk] . [tk, F] -> [B, F], f32 accumulation.
    partial = jnp.dot(x_ref[...], wc_ref[...],
                      preferred_element_type=jnp.float32)

    @pl.when(k == 0)
    def _():                       # first step: plain store (no zero-fill/RMW)
        acc_ref[...] = partial

    @pl.when(k > 0)
    def _():
        acc_ref[...] += partial

    @pl.when(k == pl.num_programs(0) - 1)
    def _():
        d4 = w1_ref.shape[1]       # feat_dim // 4
        d8 = w2_ref.shape[1]       # feat_dim // 8
        dop = w3_ref.shape[1]      # padded output dim (128)

        # conv1 bias + LeakyReLU   (dropout1: identity in eval)
        h = _leaky_relu_f32(acc_ref[...] + b_ref[0:1, :]).astype(jnp.bfloat16)

        # fc1 + LeakyReLU          (dropout2: identity in eval)
        h = jnp.dot(h, w1_ref[...], preferred_element_type=jnp.float32)
        h = _leaky_relu_f32(h + b_ref[1:2, :d4]).astype(jnp.bfloat16)

        # fc2 + LeakyReLU
        h = jnp.dot(h, w2_ref[...], preferred_element_type=jnp.float32)
        h = _leaky_relu_f32(h + b_ref[2:3, :d8]).astype(jnp.bfloat16)

        # fc3 (no activation)
        out = jnp.dot(h, w3_ref[...], preferred_element_type=jnp.float32)
        o_ref[...] = (out + b_ref[3:4, :dop]).astype(o_ref.dtype)


# ---------------------------------------------------------------------------
# One-time parameter preparation (hoisted out of the per-call hot path)
# ---------------------------------------------------------------------------
def prepare_params(params):
    """Cast/transpose/pad weights and pack biases ONCE (cache the result)."""
    conv_w = params["conv1_w"]
    F = conv_w.shape[0]
    d4 = params["fc1_w"].shape[0]
    d8 = params["fc2_w"].shape[0]
    dim_out = params["fc3_w"].shape[0]
    out_pad = ((dim_out + 127) // 128) * 128

    assert F % 128 == 0, "feat_dim must be a multiple of 128"
    assert out_pad <= F, "bias packing assumes dim_output <= feat_dim"

    # [in, out] bf16 weights -> standard (1,0) contraction, contiguous K rows.
    wc_t = conv_w.reshape(F, F).T.astype(jnp.bfloat16)           # [F, F]
    w1_t = params["fc1_w"].T.astype(jnp.bfloat16)                # [F, F//4]
    w2_t = params["fc2_w"].T.astype(jnp.bfloat16)                # [F//4, F//8]
    w3_t = jnp.zeros((d8, out_pad), jnp.bfloat16).at[:, :dim_out].set(
        params["fc3_w"].T.astype(jnp.bfloat16))                  # [F//8, 128]

    # All biases packed into one small (4, F) f32 array -> single tiny DMA.
    biases = jnp.zeros((4, F), jnp.float32)
    biases = biases.at[0, :F].set(params["conv1_b"])
    biases = biases.at[1, :d4].set(params["fc1_b"])
    biases = biases.at[2, :d8].set(params["fc2_b"])
    biases = biases.at[3, :dim_out].set(params["fc3_b"])

    return {
        "wc_t": wc_t, "w1_t": w1_t, "w2_t": w2_t, "w3_t": w3_t,
        "biases": biases,
        "feat_dim": F, "d4": d4, "d8": d8,
        "dim_output": dim_out, "out_pad": out_pad,
    }


# ---------------------------------------------------------------------------
# Forward wrapper
# ---------------------------------------------------------------------------
def _head_call(x_pad, prepared, tk, single_buffer_residents):
    F = prepared["feat_dim"]
    d4, d8 = prepared["d4"], prepared["d8"]
    out_pad = prepared["out_pad"]
    B_pad = x_pad.shape[0]

    def resident(shape):
        # Constant-index (resident) blocks: the 2nd pipeline buffer is dead
        # VMEM, so request single buffering when supported.
        if single_buffer_residents:
            return pl.BlockSpec(shape, lambda k: (0, 0),
                                pipeline_mode=pl.Buffered(1))
        return pl.BlockSpec(shape, lambda k: (0, 0))

    return pl.pallas_call(
        head_kernel,
        out_shape=jax.ShapeDtypeStruct((B_pad, out_pad), jnp.float32),
        grid=(F // tk,),
        in_specs=[
            pl.BlockSpec((B_pad, tk), lambda k: (0, k)),   # x K-chunk
            pl.BlockSpec((tk, F), lambda k: (k, 0)),       # conv1 W K-slab (contiguous rows)
            resident((F, d4)),                             # fc1 W   (resident)
            resident((d4, d8)),                            # fc2 W   (resident)
            resident((d8, out_pad)),                       # fc3 W   (resident)
            resident((4, F)),                              # packed biases
        ],
        out_specs=pl.BlockSpec((B_pad, out_pad), lambda k: (0, 0)),
        scratch_shapes=[pltpu.VMEM((B_pad, F), jnp.float32)],   # conv1 accum
        compiler_params=pltpu.CompilerParams(
            dimension_semantics=("arbitrary",)),
    )(x_pad, prepared["wc_t"], prepared["w1_t"], prepared["w2_t"],
      prepared["w3_t"], prepared["biases"])


def model_head(feats_nchw, prepared):
    """feats_nchw: [B, feat_dim, 1, 1] backbone output (NCHW, globally pooled)."""
    B, F, H, W = feats_nchw.shape
    assert H == 1 and W == 1, "backbone output is globally avg-pooled to 1x1"
    assert F == prepared["feat_dim"]
    dim_out = prepared["dim_output"]

    B_pad = ((B + 7) // 8) * 8
    tk = _pick_tk(F)

    # Activations are the only per-call prep: reshape, pad rows, bf16 cast.
    x = feats_nchw.reshape(B, F).astype(jnp.bfloat16)
    x_pad = jnp.zeros((B_pad, F), jnp.bfloat16).at[:B].set(x)

    try:
        out_full = _head_call(x_pad, prepared, tk, single_buffer_residents=True)
        out_full = jax.block_until_ready(out_full)
    except Exception:
        # Fallback for jax builds where pipeline_mode=pl.Buffered(1) is not
        # accepted by the Mosaic pallas_call lowering.  Double-buffered
        # residents still fit the default scoped VMEM at tk <= 1024.
        out_full = _head_call(x_pad, prepared, tk, single_buffer_residents=False)

    return out_full[:B, :dim_out]


# ---------------------------------------------------------------------------
# Synthetic params + pure-JAX reference
# ---------------------------------------------------------------------------
def init_params(key, feat_dim, dim_output):
    """Deterministic synthetic parameters matching the nn.Module layer shapes."""
    ks = jax.random.split(key, 8)
    d4, d8 = feat_dim // 4, feat_dim // 8

    def lin(kw, kb, fan_out, fan_in):
        scale = 1.0 / jnp.sqrt(fan_in)
        w = jax.random.uniform(kw, (fan_out, fan_in), jnp.float32, -scale, scale)
        b = jax.random.uniform(kb, (fan_out,), jnp.float32, -scale, scale)
        return w, b

    conv_w, conv_b = lin(ks[0], ks[1], feat_dim, feat_dim)
    fc1_w, fc1_b = lin(ks[2], ks[3], d4, feat_dim)
    fc2_w, fc2_b = lin(ks[4], ks[5], d8, d4)
    fc3_w, fc3_b = lin(ks[6], ks[7], dim_output, d8)

    return {
        "conv1_w": conv_w.reshape(feat_dim, feat_dim, 1, 1),   # Conv2d(k=1) weight
        "conv1_b": conv_b,
        "fc1_w": fc1_w, "fc1_b": fc1_b,
        "fc2_w": fc2_w, "fc2_b": fc2_b,
        "fc3_w": fc3_w, "fc3_b": fc3_b,
    }


def reference_head(feats_nchw, params):
    """Pure-JAX f32 reference of the head (PyTorch semantics, eval mode)."""
    B, F, _, _ = feats_nchw.shape
    x = feats_nchw.reshape(B, F)
    lrelu = lambda v: jnp.where(v > 0, v, 0.1 * v)
    h = lrelu(x @ params["conv1_w"].reshape(F, F).T + params["conv1_b"])
    h = lrelu(h @ params["fc1_w"].T + params["fc1_b"])
    h = lrelu(h @ params["fc2_w"].T + params["fc2_b"])
    return h @ params["fc3_w"].T + params["fc3_b"]


if __name__ == "__main__":
    # Small shapes consistent with the module: feat_dim scaled down from 2048.
    B, FEAT_DIM, DIM_OUT = 2, 512, 18

    key = jax.random.PRNGKey(0)
    k_feat, k_param = jax.random.split(key)

    # Stand-in for backbone(img): avg-pooled feature map [B, feat_dim, 1, 1].
    feats = jax.random.normal(k_feat, (B, FEAT_DIM, 1, 1), jnp.float32)
    params = init_params(k_param, FEAT_DIM, DIM_OUT)

    prepared = prepare_params(params)   # one-time prep (cache in production)

    out = model_head(feats, prepared)
    out = jax.block_until_ready(out)

    ref = reference_head(feats, params)
    assert out.shape == (B, DIM_OUT)
    # bf16 MXU operands (f32 accumulation) -> loosened tolerance vs f32 ref.
    assert jnp.allclose(out, ref, atol=5e-2, rtol=5e-2), "mismatch vs reference"

    print("KERNEL_OK")
</pallas_src>

<mosaic_0001>
module attributes {stable_mosaic.version = 11 : i64} {
  func.func @head_kernel(%arg0: i32, %arg1: memref<8x512xbf16, #tpu.memory_space<vmem>>, %arg2: memref<512x512xbf16, #tpu.memory_space<vmem>>, %arg3: memref<512x128xbf16, #tpu.memory_space<vmem>>, %arg4: memref<128x64xbf16, #tpu.memory_space<vmem>>, %arg5: memref<64x128xbf16, #tpu.memory_space<vmem>>, %arg6: memref<4x512xf32, #tpu.memory_space<vmem>>, %arg7: memref<8x128xf32, #tpu.memory_space<vmem>>, %arg8: memref<8x512xf32, #tpu.memory_space<vmem>>) attributes {dimension_semantics = [#tpu.dimension_semantics<arbitrary>], iteration_bounds = array<i64: 1>, scalar_prefetch = 0 : i64, scratch_operands = 1 : i64, tpu.core_type = #tpu.core_type<tc>, window_params = [{transform_indices = @transform_0, window_bounds = array<i64: 8, 512>}, {transform_indices = @transform_1, window_bounds = array<i64: 512, 512>}, {pipeline_mode = #tpu.pipeline_mode<synchronous>, transform_indices = @transform_2, window_bounds = array<i64: 512, 128>}, {pipeline_mode = #tpu.pipeline_mode<synchronous>, transform_indices = @transform_3, window_bounds = array<i64: 128, 64>}, {pipeline_mode = #tpu.pipeline_mode<synchronous>, transform_indices = @transform_4, window_bounds = array<i64: 64, 128>}, {pipeline_mode = #tpu.pipeline_mode<synchronous>, transform_indices = @transform_5, window_bounds = array<i64: 4, 512>}, {pipeline_mode = #tpu.pipeline_mode<synchronous>, transform_indices = @transform_6, window_bounds = array<i64: 8, 128>}]} {
    %c0 = arith.constant 0 : index
    %c0_0 = arith.constant 0 : index
    %0 = vector.load %arg1[%c0, %c0_0] : memref<8x512xbf16, #tpu.memory_space<vmem>>, vector<8x512xbf16>
    %c0_1 = arith.constant 0 : index
    %c0_2 = arith.constant 0 : index
    %1 = vector.load %arg2[%c0_1, %c0_2] : memref<512x512xbf16, #tpu.memory_space<vmem>>, vector<512x512xbf16>
    %cst = arith.constant dense<0.000000e+00> : vector<8x512xf32>
    %2 = tpu.matmul %0, %1, %cst {dimension_numbers = #tpu.dot_dimension_numbers<[1], [0], [0], [1], [0, 0, 1, 1], [], []>} : vector<8x512xbf16>, vector<512x512xbf16>, vector<8x512xf32> -> vector<8x512xf32>
    %c0_i32 = arith.constant 0 : i32
    %3 = arith.cmpi eq, %arg0, %c0_i32 : i32
    %4 = arith.extui %3 : i1 to i32
    %c0_i32_3 = arith.constant 0 : i32
    %5 = arith.cmpi ne, %4, %c0_i32_3 : i32
    scf.if %5 {
      %c0_8 = arith.constant 0 : index
      %c0_9 = arith.constant 0 : index
      %12 = vector.load %arg8[%c0_8, %c0_9] : memref<8x512xf32, #tpu.memory_space<vmem>>, vector<8x512xf32>
      tpu.vector_store %arg8[%c0_8, %c0_9], %2 {strides = array<i32>} : memref<8x512xf32, #tpu.memory_space<vmem>>, vector<8x512xf32>,
    } else {
    }
    %c0_i32_4 = arith.constant 0 : i32
    %6 = arith.cmpi sgt, %arg0, %c0_i32_4 : i32
    %7 = arith.extui %6 : i1 to i32
    %c0_i32_5 = arith.constant 0 : i32
    %8 = arith.cmpi ne, %7, %c0_i32_5 : i32
    scf.if %8 {
      %c0_8 = arith.constant 0 : index
      %c0_9 = arith.constant 0 : index
      %12 = vector.load %arg8[%c0_8, %c0_9] : memref<8x512xf32, #tpu.memory_space<vmem>>, vector<8x512xf32>
      %13 = arith.addf %12, %2 : vector<8x512xf32>
      %c0_10 = arith.constant 0 : index
      %c0_11 = arith.constant 0 : index
      %14 = vector.load %arg8[%c0_10, %c0_11] : memref<8x512xf32, #tpu.memory_space<vmem>>, vector<8x512xf32>
      tpu.vector_store %arg8[%c0_10, %c0_11], %13 {strides = array<i32>} : memref<8x512xf32, #tpu.memory_space<vmem>>, vector<8x512xf32>,
    } else {
    }
    %c0_i32_6 = arith.constant 0 : i32
    %9 = arith.cmpi eq, %arg0, %c0_i32_6 : i32
    %10 = arith.extui %9 : i1 to i32
    %c0_i32_7 = arith.constant 0 : i32
    %11 = arith.cmpi ne, %10, %c0_i32_7 : i32
    scf.if %11 {
      %c0_8 = arith.constant 0 : index
      %c0_9 = arith.constant 0 : index
      %12 = vector.load %arg8[%c0_8, %c0_9] : memref<8x512xf32, #tpu.memory_space<vmem>>, vector<8x512xf32>
      %c0_10 = arith.constant 0 : index
      %c0_11 = arith.constant 0 : index
      %13 = vector.load %arg6[%c0_10, %c0_11] : memref<4x512xf32, #tpu.memory_space<vmem>>, vector<1x512xf32>
      %14 = vector.broadcast %13 : vector<1x512xf32> to vector<8x512xf32>
      %15 = arith.addf %12, %14 : vector<8x512xf32>
      %cst_12 = arith.constant 0.000000e+00 : f32
      %16 = vector.broadcast %cst_12 : f32 to vector<8x512xf32>
      %17 = arith.cmpf ogt, %15, %16 : vector<8x512xf32>
      %cst_13 = arith.constant 1.000000e-01 : f32
      %18 = vector.broadcast %cst_13 : f32 to vector<8x512xf32>
      %19 = arith.mulf %18, %15 : vector<8x512xf32>
      %20 = arith.select %17, %15, %19 : vector<8x512xi1>, vector<8x512xf32>
      %21 = arith.truncf %20 : vector<8x512xf32> to vector<8x512xbf16>
      %c0_14 = arith.constant 0 : index
      %c0_15 = arith.constant 0 : index
      %22 = vector.load %arg3[%c0_14, %c0_15] : memref<512x128xbf16, #tpu.memory_space<vmem>>, vector<512x128xbf16>
      %cst_16 = arith.constant dense<0.000000e+00> : vector<8x128xf32>
      %23 = tpu.matmul %21, %22, %cst_16 {dimension_numbers = #tpu.dot_dimension_numbers<[1], [0], [0], [1], [0, 0, 1, 1], [], []>} : vector<8x512xbf16>, vector<512x128xbf16>, vector<8x128xf32> -> vector<8x128xf32>
      %c1 = arith.constant 1 : index
      %c0_17 = arith.constant 0 : index
      %24 = vector.load %arg6[%c1, %c0_17] : memref<4x512xf32, #tpu.memory_space<vmem>>, vector<1x128xf32>
      %25 = vector.broadcast %24 : vector<1x128xf32> to vector<8x128xf32>
      %26 = arith.addf %23, %25 : vector<8x128xf32>
      %cst_18 = arith.constant 0.000000e+00 : f32
      %27 = vector.broadcast %cst_18 : f32 to vector<8x128xf32>
      %28 = arith.cmpf ogt, %26, %27 : vector<8x128xf32>
      %cst_19 = arith.constant 1.000000e-01 : f32
      %29 = vector.broadcast %cst_19 : f32 to vector<8x128xf32>
      %30 = arith.mulf %29, %26 : vector<8x128xf32>
      %31 = arith.select %28, %26, %30 : vector<8x128xi1>, vector<8x128xf32>
      %32 = arith.truncf %31 : vector<8x128xf32> to vector<8x128xbf16>
      %c0_20 = arith.constant 0 : index
      %c0_21 = arith.constant 0 : index
      %33 = vector.load %arg4[%c0_20, %c0_21] : memref<128x64xbf16, #tpu.memory_space<vmem>>, vector<128x64xbf16>
      %cst_22 = arith.constant dense<0.000000e+00> : vector<8x64xf32>
      %34 = tpu.matmul %32, %33, %cst_22 {dimension_numbers = #tpu.dot_dimension_numbers<[1], [0], [0], [1], [0, 0, 1, 1], [], []>} : vector<8x128xbf16>, vector<128x64xbf16>, vector<8x64xf32> -> vector<8x64xf32>
      %c2 = arith.constant 2 : index
      %c0_23 = arith.constant 0 : index
      %35 = vector.load %arg6[%c2, %c0_23] : memref<4x512xf32, #tpu.memory_space<vmem>>, vector<1x64xf32>
      %36 = vector.broadcast %35 : vector<1x64xf32> to vector<8x64xf32>
      %37 = arith.addf %34, %36 : vector<8x64xf32>
      %cst_24 = arith.constant 0.000000e+00 : f32
      %38 = vector.broadcast %cst_24 : f32 to vector<8x64xf32>
      %39 = arith.cmpf ogt, %37, %38 : vector<8x64xf32>
      %cst_25 = arith.constant 1.000000e-01 : f32
      %40 = vector.broadcast %cst_25 : f32 to vector<8x64xf32>
      %41 = arith.mulf %40, %37 : vector<8x64xf32>
      %42 = arith.select %39, %37, %41 : vector<8x64xi1>, vector<8x64xf32>
      %43 = arith.truncf %42 : vector<8x64xf32> to vector<8x64xbf16>
      %c0_26 = arith.constant 0 : index
      %c0_27 = arith.constant 0 : index
      %44 = vector.load %arg5[%c0_26, %c0_27] : memref<64x128xbf16, #tpu.memory_space<vmem>>, vector<64x128xbf16>
      %cst_28 = arith.constant dense<0.000000e+00> : vector<8x128xf32>
      %45 = tpu.matmul %43, %44, %cst_28 {dimension_numbers = #tpu.dot_dimension_numbers<[1], [0], [0], [1], [0, 0, 1, 1], [], []>} : vector<8x64xbf16>, vector<64x128xbf16>, vector<8x128xf32> -> vector<8x128xf32>
      %c3 = arith.constant 3 : index
      %c0_29 = arith.constant 0 : index
      %46 = vector.load %arg6[%c3, %c0_29] : memref<4x512xf32, #tpu.memory_space<vmem>>, vector<1x128xf32>
      %47 = vector.broadcast %46 : vector<1x128xf32> to vector<8x128xf32>
      %48 = arith.addf %45, %47 : vector<8x128xf32>
      %c0_30 = arith.constant 0 : index
      %c0_31 = arith.constant 0 : index
      %49 = vector.load %arg7[%c0_30, %c0_31] : memref<8x128xf32, #tpu.memory_space<vmem>>, vector<8x128xf32>
      tpu.vector_store %arg7[%c0_30, %c0_31], %48 {strides = array<i32>} : memref<8x128xf32, #tpu.memory_space<vmem>>, vector<8x128xf32>,
    } else {
    }
    return
  }
  func.func @transform_0(%arg0: i32) -> (i32, i32) {
    %c0_i32 = arith.constant 0 : i32
    %c0_i32_0 = arith.constant 0 : i32
    return %c0_i32, %arg0 : i32, i32
  }
  func.func @transform_1(%arg0: i32) -> (i32, i32) {
    %c0_i32 = arith.constant 0 : i32
    %c0_i32_0 = arith.constant 0 : i32
    return %arg0, %c0_i32 : i32, i32
  }
  func.func @transform_2(%arg0: i32) -> (i32, i32) {
    %c0_i32 = arith.constant 0 : i32
    %c0_i32_0 = arith.constant 0 : i32
    %c0_i32_1 = arith.constant 0 : i32
    return %c0_i32, %c0_i32_0 : i32, i32
  }
  func.func @transform_3(%arg0: i32) -> (i32, i32) {
    %c0_i32 = arith.constant 0 : i32
    %c0_i32_0 = arith.constant 0 : i32
    %c0_i32_1 = arith.constant 0 : i32
    return %c0_i32, %c0_i32_0 : i32, i32
  }
  func.func @transform_4(%arg0: i32) -> (i32, i32) {
    %c0_i32 = arith.constant 0 : i32
    %c0_i32_0 = arith.constant 0 : i32
    %c0_i32_1 = arith.constant 0 : i32
    return %c0_i32, %c0_i32_0 : i32, i32
  }
  func.func @transform_5(%arg0: i32) -> (i32, i32) {
    %c0_i32 = arith.constant 0 : i32
    %c0_i32_0 = arith.constant 0 : i32
    %c0_i32_1 = arith.constant 0 : i32
    return %c0_i32, %c0_i32_0 : i32, i32
  }
  func.func @transform_6(%arg0: i32) -> (i32, i32) {
    %c0_i32 = arith.constant 0 : i32
    %c0_i32_0 = arith.constant 0 : i32
    %c0_i32_1 = arith.constant 0 : i32
    return %c0_i32, %c0_i32_0 : i32, i32
  }
}

module attributes {stable_mosaic.version = 11 : i64} {
  func.func @head_kernel(%arg0: i32, %arg1: memref<8x512xbf16, #tpu.memory_space<vmem>>, %arg2: memref<512x512xbf16, #tpu.memory_space<vmem>>, %arg3: memref<512x128xbf16, #tpu.memory_space<vmem>>, %arg4: memref<128x64xbf16, #tpu.memory_space<vmem>>, %arg5: memref<64x128xbf16, #tpu.memory_space<vmem>>, %arg6: memref<4x512xf32, #tpu.memory_space<vmem>>, %arg7: memref<8x128xf32, #tpu.memory_space<vmem>>, %arg8: memref<8x512xf32, #tpu.memory_space<vmem>>) attributes {dimension_semantics = [#tpu.dimension_semantics<arbitrary>], iteration_bounds = array<i64: 1>, scalar_prefetch = 0 : i64, scratch_operands = 1 : i64, tpu.core_type = #tpu.core_type<tc>, window_params = [{transform_indices = @transform_0, window_bounds = array<i64: 8, 512>}, {transform_indices = @transform_1, window_bounds = array<i64: 512, 512>}, {pipeline_mode = #tpu.pipeline_mode<synchronous>, transform_indices = @transform_2, window_bounds = array<i64: 512, 128>}, {pipeline_mode = #tpu.pipeline_mode<synchronous>, transform_indices = @transform_3, window_bounds = array<i64: 128, 64>}, {pipeline_mode = #tpu.pipeline_mode<synchronous>, transform_indices = @transform_4, window_bounds = array<i64: 64, 128>}, {pipeline_mode = #tpu.pipeline_mode<synchronous>, transform_indices = @transform_5, window_bounds = array<i64: 4, 512>}, {pipeline_mode = #tpu.pipeline_mode<synchronous>, transform_indices = @transform_6, window_bounds = array<i64: 8, 128>}]} {
    %c0 = arith.constant 0 : index
    %c0_0 = arith.constant 0 : index
    %0 = vector.load %arg1[%c0, %c0_0] : memref<8x512xbf16, #tpu.memory_space<vmem>>, vector<8x512xbf16>
    %c0_1 = arith.constant 0 : index
    %c0_2 = arith.constant 0 : index
    %1 = vector.load %arg2[%c0_1, %c0_2] : memref<512x512xbf16, #tpu.memory_space<vmem>>, vector<512x512xbf16>
    %cst = arith.constant dense<0.000000e+00> : vector<8x512xf32>
    %2 = tpu.matmul %0, %1, %cst {dimension_numbers = #tpu.dot_dimension_numbers<[1], [0], [0], [1], [0, 0, 1, 1], [], []>} : vector<8x512xbf16>, vector<512x512xbf16>, vector<8x512xf32> -> vector<8x512xf32>
    %c0_i32 = arith.constant 0 : i32
    %3 = arith.cmpi eq, %arg0, %c0_i32 : i32
    %4 = arith.extui %3 : i1 to i32
    %c0_i32_3 = arith.constant 0 : i32
    %5 = arith.cmpi ne, %4, %c0_i32_3 : i32
    scf.if %5 {
      %c0_8 = arith.constant 0 : index
      %c0_9 = arith.constant 0 : index
      %12 = vector.load %arg8[%c0_8, %c0_9] : memref<8x512xf32, #tpu.memory_space<vmem>>, vector<8x512xf32>
      tpu.vector_store %arg8[%c0_8, %c0_9], %2 {strides = array<i32>} : memref<8x512xf32, #tpu.memory_space<vmem>>, vector<8x512xf32>,
    } else {
    }
    %c0_i32_4 = arith.constant 0 : i32
    %6 = arith.cmpi sgt, %arg0, %c0_i32_4 : i32
    %7 = arith.extui %6 : i1 to i32
    %c0_i32_5 = arith.constant 0 : i32
    %8 = arith.cmpi ne, %7, %c0_i32_5 : i32
    scf.if %8 {
      %c0_8 = arith.constant 0 : index
      %c0_9 = arith.constant 0 : index
      %12 = vector.load %arg8[%c0_8, %c0_9] : memref<8x512xf32, #tpu.memory_space<vmem>>, vector<8x512xf32>
      %13 = arith.addf %12, %2 : vector<8x512xf32>
      %c0_10 = arith.constant 0 : index
      %c0_11 = arith.constant 0 : index
      %14 = vector.load %arg8[%c0_10, %c0_11] : memref<8x512xf32, #tpu.memory_space<vmem>>, vector<8x512xf32>
      tpu.vector_store %arg8[%c0_10, %c0_11], %13 {strides = array<i32>} : memref<8x512xf32, #tpu.memory_space<vmem>>, vector<8x512xf32>,
    } else {
    }
    %c0_i32_6 = arith.constant 0 : i32
    %9 = arith.cmpi eq, %arg0, %c0_i32_6 : i32
    %10 = arith.extui %9 : i1 to i32
    %c0_i32_7 = arith.constant 0 : i32
    %11 = arith.cmpi ne, %10, %c0_i32_7 : i32
    scf.if %11 {
      %c0_8 = arith.constant 0 : index
      %c0_9 = arith.constant 0 : index
      %12 = vector.load %arg8[%c0_8, %c0_9] : memref<8x512xf32, #tpu.memory_space<vmem>>, vector<8x512xf32>
      %c0_10 = arith.constant 0 : index
      %c0_11 = arith.constant 0 : index
      %13 = vector.load %arg6[%c0_10, %c0_11] : memref<4x512xf32, #tpu.memory_space<vmem>>, vector<1x512xf32>
      %14 = vector.broadcast %13 : vector<1x512xf32> to vector<8x512xf32>
      %15 = arith.addf %12, %14 : vector<8x512xf32>
      %cst_12 = arith.constant 0.000000e+00 : f32
      %16 = vector.broadcast %cst_12 : f32 to vector<8x512xf32>
      %17 = arith.cmpf ogt, %15, %16 : vector<8x512xf32>
      %cst_13 = arith.constant 1.000000e-01 : f32
      %18 = vector.broadcast %cst_13 : f32 to vector<8x512xf32>
      %19 = arith.mulf %18, %15 : vector<8x512xf32>
      %20 = arith.select %17, %15, %19 : vector<8x512xi1>, vector<8x512xf32>
      %21 = arith.truncf %20 : vector<8x512xf32> to vector<8x512xbf16>
      %c0_14 = arith.constant 0 : index
      %c0_15 = arith.constant 0 : index
      %22 = vector.load %arg3[%c0_14, %c0_15] : memref<512x128xbf16, #tpu.memory_space<vmem>>, vector<512x128xbf16>
      %cst_16 = arith.constant dense<0.000000e+00> : vector<8x128xf32>
      %23 = tpu.matmul %21, %22, %cst_16 {dimension_numbers = #tpu.dot_dimension_numbers<[1], [0], [0], [1], [0, 0, 1, 1], [], []>} : vector<8x512xbf16>, vector<512x128xbf16>, vector<8x128xf32> -> vector<8x128xf32>
      %c1 = arith.constant 1 : index
      %c0_17 = arith.constant 0 : index
      %24 = vector.load %arg6[%c1, %c0_17] : memref<4x512xf32, #tpu.memory_space<vmem>>, vector<1x128xf32>
      %25 = vector.broadcast %24 : vector<1x128xf32> to vector<8x128xf32>
      %26 = arith.addf %23, %25 : vector<8x128xf32>
      %cst_18 = arith.constant 0.000000e+00 : f32
      %27 = vector.broadcast %cst_18 : f32 to vector<8x128xf32>
      %28 = arith.cmpf ogt, %26, %27 : vector<8x128xf32>
      %cst_19 = arith.constant 1.000000e-01 : f32
      %29 = vector.broadcast %cst_19 : f32 to vector<8x128xf32>
      %30 = arith.mulf %29, %26 : vector<8x128xf32>
      %31 = arith.select %28, %26, %30 : vector<8x128xi1>, vector<8x128xf32>
      %32 = arith.truncf %31 : vector<8x128xf32> to vector<8x128xbf16>
      %c0_20 = arith.constant 0 : index
      %c0_21 = arith.constant 0 : index
      %33 = vector.load %arg4[%c0_20, %c0_21] : memref<128x64xbf16, #tpu.memory_space<vmem>>, vector<128x64xbf16>
      %cst_22 = arith.constant dense<0.000000e+00> : vector<8x64xf32>
      %34 = tpu.matmul %32, %33, %cst_22 {dimension_numbers = #tpu.dot_dimension_numbers<[1], [0], [0], [1], [0, 0, 1, 1], [], []>} : vector<8x128xbf16>, vector<128x64xbf16>, vector<8x64xf32> -> vector<8x64xf32>
      %c2 = arith.constant 2 : index
      %c0_23 = arith.constant 0 : index
      %35 = vector.load %arg6[%c2, %c0_23] : memref<4x512xf32, #tpu.memory_space<vmem>>, vector<1x64xf32>
      %36 = vector.broadcast %35 : vector<1x64xf32> to vector<8x64xf32>
      %37 = arith.addf %34, %36 : vector<8x64xf32>
      %cst_24 = arith.constant 0.000000e+00 : f32
      %38 = vector.broadcast %cst_24 : f32 to vector<8x64xf32>
      %39 = arith.cmpf ogt, %37, %38 : vector<8x64xf32>
      %cst_25 = arith.constant 1.000000e-01 : f32
      %40 = vector.broadcast %cst_25 : f32 to vector<8x64xf32>
      %41 = arith.mulf %40, %37 : vector<8x64xf32>
      %42 = arith.select %39, %37, %41 : vector<8x64xi1>, vector<8x64xf32>
      %43 = arith.truncf %42 : vector<8x64xf32> to vector<8x64xbf16>
      %c0_26 = arith.constant 0 : index
      %c0_27 = arith.constant 0 : index
      %44 = vector.load %arg5[%c0_26, %c0_27] : memref<64x128xbf16, #tpu.memory_space<vmem>>, vector<64x128xbf16>
      %cst_28 = arith.constant dense<0.000000e+00> : vector<8x128xf32>
      %45 = tpu.matmul %43, %44, %cst_28 {dimension_numbers = #tpu.dot_dimension_numbers<[1], [0], [0], [1], [0, 0, 1, 1], [], []>} : vector<8x64xbf16>, vector<64x128xbf16>, vector<8x128xf32> -> vector<8x128xf32>
      %c3 = arith.constant 3 : index
      %c0_29 = arith.constant 0 : index
      %46 = vector.load %arg6[%c3, %c0_29] : memref<4x512xf32, #tpu.memory_space<vmem>>, vector<1x128xf32>
      %47 = vector.broadcast %46 : vector<1x128xf32> to vector<8x128xf32>
      %48 = arith.addf %45, %47 : vector<8x128xf32>
      %c0_30 = arith.constant 0 : index
      %c0_31 = arith.constant 0 : index
      %49 = vector.load %arg7[%c0_30, %c0_31] : memref<8x128xf32, #tpu.memory_space<vmem>>, vector<8x128xf32>
      tpu.vector_store %arg7[%c0_30, %c0_31], %48 {strides = array<i32>} : memref<8x128xf32, #tpu.memory_space<vmem>>, vector<8x128xf32>,
    } else {
    }
    return
  }
  func.func @transform_0(%arg0: i32) -> (i32, i32) {
    %c0_i32 = arith.constant 0 : i32
    %c0_i32_0 = arith.constant 0 : i32
    return %c0_i32, %arg0 : i32, i32
  }
  func.func @transform_1(%arg0: i32) -> (i32, i32) {
    %c0_i32 = arith.constant 0 : i32
    %c0_i32_0 = arith.constant 0 : i32
    return %arg0, %c0_i32 : i32, i32
  }
  func.func @transform_2(%arg0: i32) -> (i32, i32) {
    %c0_i32 = arith.constant 0 : i32
    %c0_i32_0 = arith.constant 0 : i32
    %c0_i32_1 = arith.constant 0 : i32
    return %c0_i32, %c0_i32_0 : i32, i32
  }
  func.func @transform_3(%arg0: i32) -> (i32, i32) {
    %c0_i32 = arith.constant 0 : i32
    %c0_i32_0 = arith.constant 0 : i32
    %c0_i32_1 = arith.constant 0 : i32
    return %c0_i32, %c0_i32_0 : i32, i32
  }
  func.func @transform_4(%arg0: i32) -> (i32, i32) {
    %c0_i32 = arith.constant 0 : i32
    %c0_i32_0 = arith.constant 0 : i32
    %c0_i32_1 = arith.constant 0 : i32
    return %c0_i32, %c0_i32_0 : i32, i32
  }
  func.func @transform_5(%arg0: i32) -> (i32, i32) {
    %c0_i32 = arith.constant 0 : i32
    %c0_i32_0 = arith.constant 0 : i32
    %c0_i32_1 = arith.constant 0 : i32
    return %c0_i32, %c0_i32_0 : i32, i32
  }
  func.func @transform_6(%arg0: i32) -> (i32, i32) {
    %c0_i32 = arith.constant 0 : i32
    %c0_i32_0 = arith.constant 0 : i32
    %c0_i32_1 = arith.constant 0 : i32
    return %c0_i32, %c0_i32_0 : i32, i32
  }
}

</mosaic_0001>

<bundles_post_ra>
// kernel: tpu_custom_call.1
= control target key start
LH: loop header
LB: loop body
LE: loop exit
PB: predicated region body
PF: predicated region fallthrough
CT: control target
= control target key end

     0   :  { %11 = vsyncpa [#allocation4], 0  ;;  %s2367_s0 = inlined_call_operand.vmem [shape: bf16[8,512], index: 0, kind: input, shape index: {}]   ;;  %s2368_s1 = inlined_call_operand.hbm [shape: bf16[512,512], index: 1, kind: input, shape index: {}]   ;;  %s2369_s2 = inlined_call_operand.hbm [shape: bf16[512,128], index: 2, kind: input, shape index: {}]   ;;  %s2370_s3 = inlined_call_operand.vmem [shape: bf16[128,64], index: 3, kind: input, shape index: {}]   ;;  %s2371_s4 = inlined_call_operand.vmem [shape: bf16[64,128], index: 4, kind: input, shape index: {}]   ;;  %s2372_s5 = inlined_call_operand.vmem [shape: f32[4,512], index: 5, kind: input, shape index: {}]   ;;  %s2373_s6 = inlined_call_operand.hbm [shape: f32[8,128], index: 6, kind: output, shape index: {}]  }
   0x1   :  { %12 = vsyncpa [#allocation7], 0 }
   0x2   :  { %13 = vsyncpa [#allocation5], 0  ;;  %s2221_s21 = smov [#allocation3]   ;;  %s2149_s25 = scalar_lea.hbm %s2368_s1, 16384 }
   0x3   :  { %s21_s22 = sshll.u32 %s2221_s21, 4  ;;  %p2150_p0 = scmp.ne.s32.totalorder %s2368_s1, %s2149_s25  ;;  %s22_s22 = int_to_ptr.vmem [resolvable:$true] %s21_s22 }
   0x4   :  { %p2153_p1 = scmp.lt.u32.totalorder %s2149_s25, %s2368_s1 }
   0x6   :  { %p2155_p2 = pnand %p2153_p1, %p2150_p0 }
   0x8   :  { %2158 = shalt.err (!%p2155_p2)
}
   0x9   :  { %s2159_s30 = scalar_lea.vmem %s22_s22, 16384  ;;  %p2164_p4 = scmp.lt.s32.totalorder %s22_s22, %s22_s22 }
   0xa   :  { %p2160_p3 = scmp.ne.s32.totalorder %s22_s22, %s2159_s30  ;;  %p2165_p5 = scmp.lt.s32.totalorder %s2159_s30, %s2159_s30 }
   0xc   :  { %p2166_p6 = por %p2165_p5, %p2164_p4 }
   0xe   :  { %p2167_p7 = pnand %p2166_p6, %p2160_p3 }
  0x10   :  { %2170 = shalt.err (!%p2167_p7)
}
  0x11   :  { %s2222_s7 = smov 256   ;;  %s2223_s8 = smov 16  }
  0x12   :  { %27 = dma.hbm_to_vmem [thread:$0]  %s2368_s1, 16384, %s22_s22, [#allocation4], %s2222_s7, %s2222_s7, %s2223_s8  }
  0x13   :  { %s2224_s11 = smov [#allocation6]   ;;  %s2171_s15 = scalar_lea.hbm %s2369_s2, 4096 }
  0x14   :  { %s33_s12 = sshll.u32 %s2224_s11, 4  ;;  %p2172_p8 = scmp.ne.s32.totalorder %s2369_s2, %s2171_s15  ;;  %s34_s12 = int_to_ptr.vmem [resolvable:$true] %s33_s12 }
  0x15   :  { %p2175_p9 = scmp.lt.u32.totalorder %s2171_s15, %s2369_s2 }
  0x17   :  { %p2177_p10 = pnand %p2175_p9, %p2172_p8 }
  0x19   :  { %2180 = shalt.err (!%p2177_p10)
}
  0x1a   :  { %s2181_s20 = scalar_lea.vmem %s34_s12, 4096  ;;  %p2186_p12 = scmp.lt.s32.totalorder %s34_s12, %s34_s12 }
  0x1b   :  { %p2182_p11 = scmp.ne.s32.totalorder %s34_s12, %s2181_s20  ;;  %p2187_p13 = scmp.lt.s32.totalorder %s2181_s20, %s2181_s20 }
  0x1d   :  { %p2188_p0 = por %p2187_p13, %p2186_p12 }
  0x1f   :  { %p2189_p1 = pnand %p2188_p0, %p2182_p11 }
  0x21   :  { %2192 = shalt.err (!%p2189_p1)
}
  0x22   :  { %s2225_s1 = smov 64   ;;  %s2226_s21 = smov 4  }
  0x23   :  { %39 = dma.hbm_to_vmem [thread:$0]  %s2369_s2, 4096, %s34_s12, [#allocation7], %s2225_s1, %s2225_s1, %s2226_s21  }
  0x24   :  { %2215 = dma.done.wait [#allocation4], 16384  }
  0x25   :  { %2216 = vsyncadd [#allocation4], 4294950912 }
  0x26   :  { %2217 = dma.done.wait [#allocation7], 4096  }
  0x27   :  { %2218 = vsyncadd [#allocation7], 4294963200  ;;  %v1909_v0 = vld [vmem:[#allocation3 + $0x4] ss:$16 sps:$4 sm:$0xff]   ;;  %v1913_v2 = vld [vmem:[#allocation3] ss:$16 sps:$4 sm:$0xff]  }
  0x28   :  { %v1911_v1 = vld [vmem:[#allocation3 + $0x204] ss:$16 sps:$4 sm:$0xff]   ;;  %837 = vmatprep.subr.bf16.mxu0 %v1909_v0  ;;  %v1914_v3 = vld [vmem:[#allocation3 + $0x200] ss:$16 sps:$4 sm:$0xff]   ;;  %v54_v48 = vld [vmem:[%s2367_s0 + $0x8] sm:$0xff]  ;;  %vm2228_vm4 = vmmov 0  }
  0x29   :  { %878 = vmatprep.subr.bf16.mxu1 %v1911_v1  ;;  %v1915_v4 = vld [vmem:[#allocation3 + $0x24] ss:$16 sps:$4 sm:$0xff]   ;;  %838 = vmatpush1.bf16.msra.mxu0 %v1913_v2  ;;  %v1919_v6 = vld [vmem:[#allocation3 + $0x20] ss:$16 sps:$4 sm:$0xff]   ;;  %v1633_v51 = vcombine.high %v54_v48, %v54_v48  ;;  %vm1569_vm7 = vcmask 523264  }
  0x2a   :  { %879 = vmatpush1.bf16.msra.mxu1 %v1914_v3  ;;  %v1917_v5 = vld [vmem:[#allocation3 + $0x224] ss:$16 sps:$4 sm:$0xff]   ;;  %839 = vmatprep.subr.bf16.mxu0 %v1915_v4  ;;  %v1920_v7 = vld [vmem:[#allocation3 + $0x220] ss:$16 sps:$4 sm:$0xff]   ;;  %v2011_v4 = vld [vmem:[#allocation3 + $0xc] ss:$16 sps:$4 sm:$0xff]  }
  0x2b   :  { %880 = vmatprep.subr.bf16.mxu1 %v1917_v5  ;;  %v1921_v8 = vld [vmem:[#allocation3 + $0x44] ss:$16 sps:$4 sm:$0xff]   ;;  %v1925_v10 = vld [vmem:[#allocation3 + $0x40] ss:$16 sps:$4 sm:$0xff]   ;;  %910 = vmatprep.mubr.bf16.mxu1 %v1633_v51  ;;  %v2014_v5 = vld [vmem:[#allocation3 + $0x20c] ss:$16 sps:$4 sm:$0xff]  }
  0x2c   :  { %v1923_v9 = vld [vmem:[#allocation3 + $0x244] ss:$16 sps:$4 sm:$0xff]   ;;  %v1926_v11 = vld [vmem:[#allocation3 + $0x240] ss:$16 sps:$4 sm:$0xff]  }
  0x2d   :  { %840 = vmatpush1.bf16.msra.mxu0 %v1919_v6  ;;  %v1927_v12 = vld [vmem:[#allocation3 + $0x64] ss:$16 sps:$4 sm:$0xff]   ;;  %v1931_v14 = vld [vmem:[#allocation3 + $0x60] ss:$16 sps:$4 sm:$0xff]  }
  0x2e   :  { %881 = vmatpush1.bf16.msra.mxu1 %v1920_v7  ;;  %841 = vmatprep.subr.bf16.mxu0 %v1921_v8  ;;  %v1929_v13 = vld [vmem:[#allocation3 + $0x264] ss:$16 sps:$4 sm:$0xff]   ;;  %v1932_v15 = vld [vmem:[#allocation3 + $0x260] ss:$16 sps:$4 sm:$0xff]   ;;  %v2300_v7 = vcombine.low %v54_v48, %v54_v48  ;;  %v2009_v8 = vld [vmem:[#allocation3 + $0x8] ss:$16 sps:$4 sm:$0xff]  }
  0x2f   :  { %882 = vmatprep.subr.bf16.mxu1 %v1923_v9  ;;  %v1933_v16 = vld [vmem:[#allocation3 + $0x84] ss:$16 sps:$4 sm:$0xff]   ;;  %v1937_v18 = vld [vmem:[#allocation3 + $0x80] ss:$16 sps:$4 sm:$0xff]   ;;  %v2012_v9 = vld [vmem:[#allocation3 + $0x208] ss:$16 sps:$4 sm:$0xff]  }
  0x30   :  { %v1935_v17 = vld [vmem:[#allocation3 + $0x284] ss:$16 sps:$4 sm:$0xff]   ;;  %v1938_v19 = vld [vmem:[#allocation3 + $0x280] ss:$16 sps:$4 sm:$0xff]   ;;  %v2069_v48 = vld [vmem:[#allocation3 + $0x148] ss:$16 sps:$4 sm:$0xff]  }
  0x31   :  { %842 = vmatpush1.bf16.msra.mxu0 %v1925_v10  ;;  %v1939_v20 = vld [vmem:[#allocation3 + $0xa4] ss:$16 sps:$4 sm:$0xff]   ;;  %v1943_v22 = vld [vmem:[#allocation3 + $0xa0] ss:$16 sps:$4 sm:$0xff]   ;;  %v2017_v10 = vld [vmem:[#allocation3 + $0x2c] ss:$16 sps:$4 sm:$0xff]  }
  0x32   :  { %883 = vmatpush1.bf16.msra.mxu1 %v1926_v11  ;;  %843 = vmatprep.subr.bf16.mxu0 %v1927_v12  ;;  %v1941_v21 = vld [vmem:[#allocation3 + $0x2a4] ss:$16 sps:$4 sm:$0xff]   ;;  %v1944_v23 = vld [vmem:[#allocation3 + $0x2a0] ss:$16 sps:$4 sm:$0xff]   ;;  %v2020_v11 = vld [vmem:[#allocation3 + $0x22c] ss:$16 sps:$4 sm:$0xff]  }
  0x33   :  { %884 = vmatprep.subr.bf16.mxu1 %v1929_v13  ;;  %v1945_v24 = vld [vmem:[#allocation3 + $0xc4] ss:$16 sps:$4 sm:$0xff]   ;;  %v1949_v26 = vld [vmem:[#allocation3 + $0xc0] ss:$16 sps:$4 sm:$0xff]   ;;  %v2015_v12 = vld [vmem:[#allocation3 + $0x28] ss:$16 sps:$4 sm:$0xff]  }
  0x34   :  { %v1947_v25 = vld [vmem:[#allocation3 + $0x2c4] ss:$16 sps:$4 sm:$0xff]   ;;  %v1950_v27 = vld [vmem:[#allocation3 + $0x2c0] ss:$16 sps:$4 sm:$0xff]   ;;  %v2018_v13 = vld [vmem:[#allocation3 + $0x228] ss:$16 sps:$4 sm:$0xff]  }
  0x35   :  { %844 = vmatpush1.bf16.msra.mxu0 %v1931_v14  ;;  %v1951_v28 = vld [vmem:[#allocation3 + $0xe4] ss:$16 sps:$4 sm:$0xff]   ;;  %v1955_v30 = vld [vmem:[#allocation3 + $0xe0] ss:$16 sps:$4 sm:$0xff]   ;;  %v2023_v14 = vld [vmem:[#allocation3 + $0x4c] ss:$16 sps:$4 sm:$0xff]  }
  0x36   :  { %885 = vmatpush1.bf16.msra.mxu1 %v1932_v15  ;;  %845 = vmatprep.subr.bf16.mxu0 %v1933_v16  ;;  %v1953_v29 = vld [vmem:[#allocation3 + $0x2e4] ss:$16 sps:$4 sm:$0xff]   ;;  %v1956_v31 = vld [vmem:[#allocation3 + $0x2e0] ss:$16 sps:$4 sm:$0xff]   ;;  %v2026_v15 = vld [vmem:[#allocation3 + $0x24c] ss:$16 sps:$4 sm:$0xff]  }
  0x37   :  { %886 = vmatprep.subr.bf16.mxu1 %v1935_v17  ;;  %v1957_v32 = vld [vmem:[#allocation3 + $0x104] ss:$16 sps:$4 sm:$0xff]   ;;  %v1961_v34 = vld [vmem:[#allocation3 + $0x100] ss:$16 sps:$4 sm:$0xff]   ;;  %v2021_v16 = vld [vmem:[#allocation3 + $0x48] ss:$16 sps:$4 sm:$0xff]  }
  0x38   :  { %v1959_v33 = vld [vmem:[#allocation3 + $0x304] ss:$16 sps:$4 sm:$0xff]   ;;  %v1962_v35 = vld [vmem:[#allocation3 + $0x300] ss:$16 sps:$4 sm:$0xff]   ;;  %v2024_v17 = vld [vmem:[#allocation3 + $0x248] ss:$16 sps:$4 sm:$0xff]  }
  0x39   :  { %846 = vmatpush1.bf16.msra.mxu0 %v1937_v18  ;;  %v1963_v36 = vld [vmem:[#allocation3 + $0x124] ss:$16 sps:$4 sm:$0xff]   ;;  %v1967_v38 = vld [vmem:[#allocation3 + $0x120] ss:$16 sps:$4 sm:$0xff]   ;;  %v2029_v18 = vld [vmem:[#allocation3 + $0x6c] ss:$16 sps:$4 sm:$0xff]  }
  0x3a   :  { %887 = vmatpush1.bf16.msra.mxu1 %v1938_v19  ;;  %847 = vmatprep.subr.bf16.mxu0 %v1939_v20  ;;  %v1965_v37 = vld [vmem:[#allocation3 + $0x324] ss:$16 sps:$4 sm:$0xff]   ;;  %v1968_v39 = vld [vmem:[#allocation3 + $0x320] ss:$16 sps:$4 sm:$0xff]   ;;  %v2032_v19 = vld [vmem:[#allocation3 + $0x26c] ss:$16 sps:$4 sm:$0xff]  }
  0x3b   :  { %888 = vmatprep.subr.bf16.mxu1 %v1941_v21  ;;  %v1969_v40 = vld [vmem:[#allocation3 + $0x144] ss:$16 sps:$4 sm:$0xff]   ;;  %v1973_v42 = vld [vmem:[#allocation3 + $0x140] ss:$16 sps:$4 sm:$0xff]   ;;  %v2027_v20 = vld [vmem:[#allocation3 + $0x68] ss:$16 sps:$4 sm:$0xff]  }
  0x3c   :  { %v1971_v41 = vld [vmem:[#allocation3 + $0x344] ss:$16 sps:$4 sm:$0xff]   ;;  %v1974_v43 = vld [vmem:[#allocation3 + $0x340] ss:$16 sps:$4 sm:$0xff]   ;;  %v2030_v21 = vld [vmem:[#allocation3 + $0x268] ss:$16 sps:$4 sm:$0xff]  }
  0x3d   :  { %848 = vmatpush1.bf16.msra.mxu0 %v1943_v22  ;;  %v1975_v44 = vld [vmem:[#allocation3 + $0x164] ss:$16 sps:$4 sm:$0xff]   ;;  %v1979_v49 = vld [vmem:[#allocation3 + $0x160] ss:$16 sps:$4 sm:$0xff]   ;;  %v2035_v22 = vld [vmem:[#allocation3 + $0x8c] ss:$16 sps:$4 sm:$0xff]  }
  0x3e   :  { %889 = vmatpush1.bf16.msra.mxu1 %v1944_v23  ;;  %849 = vmatprep.subr.bf16.mxu0 %v1945_v24  ;;  %v1977_v45 = vld [vmem:[#allocation3 + $0x364] ss:$16 sps:$4 sm:$0xff]   ;;  %v1980_v50 = vld [vmem:[#allocation3 + $0x360] ss:$16 sps:$4 sm:$0xff]   ;;  %v2038_v23 = vld [vmem:[#allocation3 + $0x28c] ss:$16 sps:$4 sm:$0xff]  }
  0x3f   :  { %890 = vmatprep.subr.bf16.mxu1 %v1947_v25  ;;  %v53_v46 = vld [vmem:[%s2367_s0] sm:$0xff]  ;;  %v2033_v24 = vld [vmem:[#allocation3 + $0x88] ss:$16 sps:$4 sm:$0xff]  }
  0x40   :  { %v2292_v47 = vcombine.high %v53_v46, %v53_v46  ;;  %v1981_v52 = vld [vmem:[#allocation3 + $0x184] ss:$16 sps:$4 sm:$0xff]   ;;  %v1985_v54 = vld [vmem:[#allocation3 + $0x180] ss:$16 sps:$4 sm:$0xff]   ;;  %v2298_v6 = vcombine.low %v53_v46, %v53_v46  ;;  %v2036_v25 = vld [vmem:[#allocation3 + $0x288] ss:$16 sps:$4 sm:$0xff]  }
  0x41   :  { %850 = vmatpush1.bf16.msra.mxu0 %v1949_v26  ;;  %v1983_v53 = vld [vmem:[#allocation3 + $0x384] ss:$16 sps:$4 sm:$0xff]   ;;  %v1986_v55 = vld [vmem:[#allocation3 + $0x380] ss:$16 sps:$4 sm:$0xff]   ;;  %v2041_v26 = vld [vmem:[#allocation3 + $0xac] ss:$16 sps:$4 sm:$0xff]  }
  0x42   :  { %891 = vmatpush1.bf16.msra.mxu1 %v1950_v27  ;;  %851 = vmatprep.subr.bf16.mxu0 %v1951_v28  ;;  %v1987_v56 = vld [vmem:[#allocation3 + $0x1a4] ss:$16 sps:$4 sm:$0xff]   ;;  %v1991_v58 = vld [vmem:[#allocation3 + $0x1a0] ss:$16 sps:$4 sm:$0xff]   ;;  %v2044_v27 = vld [vmem:[#allocation3 + $0x2ac] ss:$16 sps:$4 sm:$0xff]  }
  0x43   :  { %892 = vmatprep.subr.bf16.mxu1 %v1953_v29  ;;  %869 = vmatprep.mubr.bf16.mxu0 %v2292_v47  ;;  %v1989_v57 = vld [vmem:[#allocation3 + $0x3a4] ss:$16 sps:$4 sm:$0xff]   ;;  %v1992_v59 = vld [vmem:[#allocation3 + $0x3a0] ss:$16 sps:$4 sm:$0xff]   ;;  %v2039_v28 = vld [vmem:[#allocation3 + $0xa8] ss:$16 sps:$4 sm:$0xff]  }
  0x44   :  { %v1993_v60 = vld [vmem:[#allocation3 + $0x1c4] ss:$16 sps:$4 sm:$0xff]   ;;  %v1997_v62 = vld [vmem:[#allocation3 + $0x1c0] ss:$16 sps:$4 sm:$0xff]   ;;  %v2042_v29 = vld [vmem:[#allocation3 + $0x2a8] ss:$16 sps:$4 sm:$0xff]  }
  0x45   :  { %852 = vmatpush1.bf16.msra.mxu0 %v1955_v30  ;;  %v1995_v61 = vld [vmem:[#allocation3 + $0x3c4] ss:$16 sps:$4 sm:$0xff]   ;;  %v1998_v63 = vld [vmem:[#allocation3 + $0x3c0] ss:$16 sps:$4 sm:$0xff]   ;;  %v2047_v30 = vld [vmem:[#allocation3 + $0xcc] ss:$16 sps:$4 sm:$0xff]  }
  0x46   :  { %893 = vmatpush1.bf16.msra.mxu1 %v1956_v31  ;;  %853 = vmatprep.subr.bf16.mxu0 %v1957_v32  ;;  %v1999_v0 = vld [vmem:[#allocation3 + $0x1e4] ss:$16 sps:$4 sm:$0xff]   ;;  %v2003_v2 = vld [vmem:[#allocation3 + $0x1e0] ss:$16 sps:$4 sm:$0xff]   ;;  %v2050_v31 = vld [vmem:[#allocation3 + $0x2cc] ss:$16 sps:$4 sm:$0xff]  }
  0x47   :  { %894 = vmatprep.subr.bf16.mxu1 %v1959_v33  ;;  %v2001_v1 = vld [vmem:[#allocation3 + $0x3e4] ss:$16 sps:$4 sm:$0xff]   ;;  %v2004_v3 = vld [vmem:[#allocation3 + $0x3e0] ss:$16 sps:$4 sm:$0xff]   ;;  %v2045_v32 = vld [vmem:[#allocation3 + $0xc8] ss:$16 sps:$4 sm:$0xff]  }
  0x48   :  { %v2048_v33 = vld [vmem:[#allocation3 + $0x2c8] ss:$16 sps:$4 sm:$0xff]   ;;  %v2071_v46 = vld [vmem:[#allocation3 + $0x14c] ss:$16 sps:$4 sm:$0xff]  }
  0x49   :  { %854 = vmatpush1.bf16.msra.mxu0 %v1961_v34  ;;  %v2053_v34 = vld [vmem:[#allocation3 + $0xec] ss:$16 sps:$4 sm:$0xff]  }
  0x4a   :  { %895 = vmatpush1.bf16.msra.mxu1 %v1962_v35  ;;  %855 = vmatprep.subr.bf16.mxu0 %v1963_v36  ;;  %v2056_v35 = vld [vmem:[#allocation3 + $0x2ec] ss:$16 sps:$4 sm:$0xff]   ;;  %v2051_v36 = vld [vmem:[#allocation3 + $0xe8] ss:$16 sps:$4 sm:$0xff]  }
  0x4b   :  { %896 = vmatprep.subr.bf16.mxu1 %v1965_v37  ;;  %v2054_v37 = vld [vmem:[#allocation3 + $0x2e8] ss:$16 sps:$4 sm:$0xff]  }
  0x4d   :  { %856 = vmatpush1.bf16.msra.mxu0 %v1967_v38  ;;  %v2059_v38 = vld [vmem:[#allocation3 + $0x10c] ss:$16 sps:$4 sm:$0xff]  }
  0x4e   :  { %897 = vmatpush1.bf16.msra.mxu1 %v1968_v39  ;;  %857 = vmatprep.subr.bf16.mxu0 %v1969_v40  ;;  %v2062_v39 = vld [vmem:[#allocation3 + $0x30c] ss:$16 sps:$4 sm:$0xff]   ;;  %v2057_v40 = vld [vmem:[#allocation3 + $0x108] ss:$16 sps:$4 sm:$0xff]  }
  0x4f   :  { %898 = vmatprep.subr.bf16.mxu1 %v1971_v41  ;;  %v2060_v41 = vld [vmem:[#allocation3 + $0x308] ss:$16 sps:$4 sm:$0xff]  }
  0x51   :  { %858 = vmatpush1.bf16.msra.mxu0 %v1973_v42  ;;  %v2065_v42 = vld [vmem:[#allocation3 + $0x12c] ss:$16 sps:$4 sm:$0xff]  }
  0x52   :  { %899 = vmatpush1.bf16.msra.mxu1 %v1974_v43  ;;  %859 = vmatprep.subr.bf16.mxu0 %v1975_v44  ;;  %v2068_v43 = vld [vmem:[#allocation3 + $0x32c] ss:$16 sps:$4 sm:$0xff]   ;;  %v2063_v44 = vld [vmem:[#allocation3 + $0x128] ss:$16 sps:$4 sm:$0xff]  }
  0x53   :  { %900 = vmatprep.subr.bf16.mxu1 %v1977_v45  ;;  %v2066_v45 = vld [vmem:[#allocation3 + $0x328] ss:$16 sps:$4 sm:$0xff]  }
  0x55   :  { %860 = vmatpush1.bf16.msra.mxu0 %v1979_v49  ;;  %v2072_v49 = vld [vmem:[#allocation3 + $0x348] ss:$16 sps:$4 sm:$0xff]  }
  0x56   :  { %901 = vmatpush1.bf16.msra.mxu1 %v1980_v50  ;;  %861 = vmatprep.subr.bf16.mxu0 %v1981_v52  ;;  %v2077_v50 = vld [vmem:[#allocation3 + $0x16c] ss:$16 sps:$4 sm:$0xff]   ;;  %v2075_v52 = vld [vmem:[#allocation3 + $0x168] ss:$16 sps:$4 sm:$0xff]  }
  0x57   :  { %902 = vmatprep.subr.bf16.mxu1 %v1983_v53  ;;  %v2078_v53 = vld [vmem:[#allocation3 + $0x368] ss:$16 sps:$4 sm:$0xff]  }
  0x59   :  { %862 = vmatpush1.bf16.msra.mxu0 %v1985_v54  ;;  %v2083_v54 = vld [vmem:[#allocation3 + $0x18c] ss:$16 sps:$4 sm:$0xff]  }
  0x5a   :  { %903 = vmatpush1.bf16.msra.mxu1 %v1986_v55  ;;  %863 = vmatprep.subr.bf16.mxu0 %v1987_v56  ;;  %v2086_v55 = vld [vmem:[#allocation3 + $0x38c] ss:$16 sps:$4 sm:$0xff]   ;;  %v2081_v56 = vld [vmem:[#allocation3 + $0x188] ss:$16 sps:$4 sm:$0xff]  }
  0x5b   :  { %904 = vmatprep.subr.bf16.mxu1 %v1989_v57  ;;  %v2084_v57 = vld [vmem:[#allocation3 + $0x388] ss:$16 sps:$4 sm:$0xff]  }
  0x5d   :  { %864 = vmatpush1.bf16.msra.mxu0 %v1991_v58  ;;  %v2089_v58 = vld [vmem:[#allocation3 + $0x1ac] ss:$16 sps:$4 sm:$0xff]  }
  0x5e   :  { %905 = vmatpush1.bf16.msra.mxu1 %v1992_v59  ;;  %865 = vmatprep.subr.bf16.mxu0 %v1993_v60  ;;  %v2092_v59 = vld [vmem:[#allocation3 + $0x3ac] ss:$16 sps:$4 sm:$0xff]   ;;  %v2087_v60 = vld [vmem:[#allocation3 + $0x1a8] ss:$16 sps:$4 sm:$0xff]  }
  0x5f   :  { %906 = vmatprep.subr.bf16.mxu1 %v1995_v61  ;;  %v2090_v61 = vld [vmem:[#allocation3 + $0x3a8] ss:$16 sps:$4 sm:$0xff]  }
  0x61   :  { %866 = vmatpush1.bf16.msra.mxu0 %v1997_v62  ;;  %v2095_v62 = vld [vmem:[#allocation3 + $0x1cc] ss:$16 sps:$4 sm:$0xff]  }
  0x62   :  { %907 = vmatpush1.bf16.msra.mxu1 %v1998_v63  ;;  %867 = vmatprep.subr.bf16.mxu0 %v1999_v0  ;;  %v2098_v63 = vld [vmem:[#allocation3 + $0x3cc] ss:$16 sps:$4 sm:$0xff]   ;;  %v2093_v0 = vld [vmem:[#allocation3 + $0x1c8] ss:$16 sps:$4 sm:$0xff]  }
  0x63   :  { %908 = vmatprep.subr.bf16.mxu1 %v2001_v1  ;;  %v2096_v1 = vld [vmem:[#allocation3 + $0x3c8] ss:$16 sps:$4 sm:$0xff]  }
  0x65   :  { %868 = vmatpush1.bf16.msra.mxu0 %v2003_v2  ;;  %v2101_v2 = vld [vmem:[#allocation3 + $0x1ec] ss:$16 sps:$4 sm:$0xff]  }
  0x66   :  { %909 = vmatpush1.bf16.msra.mxu1 %v2004_v3  ;;  %919 = vmatprep.subr.bf16.mxu0 %v2011_v4  ;;  %v2104_v3 = vld [vmem:[#allocation3 + $0x3ec] ss:$16 sps:$4 sm:$0xff]   ;;  %v2099_v4 = vld [vmem:[#allocation3 + $0x1e8] ss:$16 sps:$4 sm:$0xff]  }
  0x67   :  { %960 = vmatprep.subr.bf16.mxu1 %v2014_v5  ;;  %v2102_v5 = vld [vmem:[#allocation3 + $0x3e8] ss:$16 sps:$4 sm:$0xff]  }
  0x68   :  { %870 = vmatmul.mubr.bf16.vlgmr.msra.gmra.mrb[0].mxu0 %v2298_v6 }
  0x69   :  { %911 = vmatmul.mubr.bf16.vlgmr.msra.gmra.mrb[0].mxu1 %v2300_v7  ;;  %920 = vmatpush1.bf16.msra.mxu0 %v2009_v8  ;;  %v2105_v8 = vld [vmem:[#allocation6 + $0x40] sm:$0xff]  }
  0x6a   :  { %961 = vmatpush1.bf16.msra.mxu1 %v2012_v9  ;;  %921 = vmatprep.subr.bf16.mxu0 %v2017_v10  ;;  %v2106_v9 = vld [vmem:[#allocation6] sm:$0xff]   ;;  %v2107_v10 = vld [vmem:[#allocation6 + $0x48] sm:$0xff]  }
  0x6b   :  { %962 = vmatprep.subr.bf16.mxu1 %v2020_v11  ;;  %951 = vmatprep.mubr.bf16.mxu0 %v2292_v47  ;;  %v2074_v47 = vld [vmem:[#allocation3 + $0x34c] ss:$16 sps:$4 sm:$0xff]  }
  0x6c   :  { %992 = vmatprep.mubr.bf16.mxu1 %v1633_v51  ;;  %v2080_v51 = vld [vmem:[#allocation3 + $0x36c] ss:$16 sps:$4 sm:$0xff]  }
  0x6d   :  { %922 = vmatpush1.bf16.msra.mxu0 %v2015_v12  ;;  %v2108_v11 = vld [vmem:[#allocation6 + $0x8] sm:$0xff]   ;;  %v2109_v12 = vld [vmem:[#allocation6 + $0x50] sm:$0xff]  }
  0x6e   :  { %963 = vmatpush1.bf16.msra.mxu1 %v2018_v13  ;;  %923 = vmatprep.subr.bf16.mxu0 %v2023_v14  ;;  %v2110_v13 = vld [vmem:[#allocation6 + $0x10] sm:$0xff]   ;;  %v2111_v14 = vld [vmem:[#allocation6 + $0x58] sm:$0xff]  }
  0x6f   :  { %964 = vmatprep.subr.bf16.mxu1 %v2026_v15  ;;  %v2112_v15 = vld [vmem:[#allocation6 + $0x18] sm:$0xff]  }
  0x71   :  { %924 = vmatpush1.bf16.msra.mxu0 %v2021_v16  ;;  %v2113_v16 = vld [vmem:[#allocation6 + $0x60] sm:$0xff]  }
  0x72   :  { %965 = vmatpush1.bf16.msra.mxu1 %v2024_v17  ;;  %925 = vmatprep.subr.bf16.mxu0 %v2029_v18  ;;  %v2114_v17 = vld [vmem:[#allocation6 + $0x20] sm:$0xff]   ;;  %v2115_v18 = vld [vmem:[#allocation6 + $0x68] sm:$0xff]  }
  0x73   :  { %966 = vmatprep.subr.bf16.mxu1 %v2032_v19  ;;  %v2118_v19 = vld [vmem:[#allocation6 + $0x30] sm:$0xff]  }
  0x75   :  { %926 = vmatpush1.bf16.msra.mxu0 %v2027_v20  ;;  %v2119_v20 = vld [vmem:[#allocation6 + $0x78] sm:$0xff]  }
  0x76   :  { %967 = vmatpush1.bf16.msra.mxu1 %v2030_v21  ;;  %927 = vmatprep.subr.bf16.mxu0 %v2035_v22  ;;  %v2120_v21 = vld [vmem:[#allocation6 + $0x38] sm:$0xff]   ;;  %v2121_v22 = vld [vmem:[#allocation6 + $0xc0] sm:$0xff]  }
  0x77   :  { %968 = vmatprep.subr.bf16.mxu1 %v2038_v23  ;;  %v2122_v23 = vld [vmem:[#allocation6 + $0x80] sm:$0xff]  }
  0x79   :  { %928 = vmatpush1.bf16.msra.mxu0 %v2033_v24  ;;  %v2123_v24 = vld [vmem:[#allocation6 + $0xc8] sm:$0xff]  }
  0x7a   :  { %969 = vmatpush1.bf16.msra.mxu1 %v2036_v25  ;;  %929 = vmatprep.subr.bf16.mxu0 %v2041_v26  ;;  %v2124_v25 = vld [vmem:[#allocation6 + $0x88] sm:$0xff]   ;;  %v2125_v26 = vld [vmem:[#allocation6 + $0xd0] sm:$0xff]  }
  0x7b   :  { %970 = vmatprep.subr.bf16.mxu1 %v2044_v27  ;;  %v2126_v27 = vld [vmem:[#allocation6 + $0x90] sm:$0xff]  }
  0x7d   :  { %930 = vmatpush1.bf16.msra.mxu0 %v2039_v28  ;;  %v2127_v28 = vld [vmem:[#allocation6 + $0xd8] sm:$0xff]  }
  0x7e   :  { %971 = vmatpush1.bf16.msra.mxu1 %v2042_v29  ;;  %931 = vmatprep.subr.bf16.mxu0 %v2047_v30  ;;  %v2128_v29 = vld [vmem:[#allocation6 + $0x98] sm:$0xff]   ;;  %v2129_v30 = vld [vmem:[#allocation6 + $0xe0] sm:$0xff]  }
  0x7f   :  { %972 = vmatprep.subr.bf16.mxu1 %v2050_v31  ;;  %v2130_v31 = vld [vmem:[#allocation6 + $0xa0] sm:$0xff]  }
  0x81   :  { %932 = vmatpush1.bf16.msra.mxu0 %v2045_v32  ;;  %v2131_v32 = vld [vmem:[#allocation6 + $0xe8] sm:$0xff]  }
  0x82   :  { %973 = vmatpush1.bf16.msra.mxu1 %v2048_v33  ;;  %933 = vmatprep.subr.bf16.mxu0 %v2053_v34  ;;  %v2132_v33 = vld [vmem:[#allocation6 + $0xa8] sm:$0xff]   ;;  %v2133_v34 = vld [vmem:[#allocation6 + $0xf0] sm:$0xff]  }
  0x83   :  { %974 = vmatprep.subr.bf16.mxu1 %v2056_v35  ;;  %v2134_v35 = vld [vmem:[#allocation6 + $0xb0] sm:$0xff]  }
  0x85   :  { %934 = vmatpush1.bf16.msra.mxu0 %v2051_v36  ;;  %v2135_v36 = vld [vmem:[#allocation6 + $0xf8] sm:$0xff]  }
  0x86   :  { %975 = vmatpush1.bf16.msra.mxu1 %v2054_v37  ;;  %935 = vmatprep.subr.bf16.mxu0 %v2059_v38  ;;  %v2136_v37 = vld [vmem:[#allocation6 + $0xb8] sm:$0xff]   ;;  %v1034_v38 = vlaneseq }
  0x87   :  { %976 = vmatprep.subr.bf16.mxu1 %v2062_v39 }
  0x88   :  { %v1035_v39 = vshrl.u32 %v1034_v38, 7 }
  0x89   :  { %936 = vmatpush1.bf16.msra.mxu0 %v2057_v40 }
  0x8a   :  { %977 = vmatpush1.bf16.msra.mxu1 %v2060_v41  ;;  %937 = vmatprep.subr.bf16.mxu0 %v2065_v42  ;;  %v1036_v40 = vsub.s32 0, %v1035_v39  ;;  %v1032_v41 = vld [vmem:[%s2372_s5] ss:$4 sm:$0xf]  ;;  %v1040_v42 = vsub.s32 1, %v1035_v39 }
  0x8b   :  { %978 = vmatprep.subr.bf16.mxu1 %v2068_v43 }
  0x8c   :  { %v1037_v43 = vrot.slane %v1032_v41, %v1036_v40 }
  0x8d   :  { %938 = vmatpush1.bf16.msra.mxu0 %v2063_v44 }
  0x8e   :  { %979 = vmatpush1.bf16.msra.mxu1 %v2066_v45  ;;  %939 = vmatprep.subr.bf16.mxu0 %v2071_v46  ;;  %v1041_v46 = vrot.slane %v1032_v41, %v1040_v42 }
  0x8f   :  { %980 = vmatprep.subr.bf16.mxu1 %v2074_v47 }
  0x91   :  { %940 = vmatpush1.bf16.msra.mxu0 %v2069_v48 }
  0x92   :  { %981 = vmatpush1.bf16.msra.mxu1 %v2072_v49  ;;  %941 = vmatprep.subr.bf16.mxu0 %v2077_v50 }
  0x93   :  { %982 = vmatprep.subr.bf16.mxu1 %v2080_v51 }
  0x95   :  { %942 = vmatpush1.bf16.msra.mxu0 %v2075_v52 }
  0x96   :  { %983 = vmatpush1.bf16.msra.mxu1 %v2078_v53  ;;  %943 = vmatprep.subr.bf16.mxu0 %v2083_v54 }
  0x97   :  { %984 = vmatprep.subr.bf16.mxu1 %v2086_v55 }
  0x99   :  { %944 = vmatpush1.bf16.msra.mxu0 %v2081_v56 }
  0x9a   :  { %985 = vmatpush1.bf16.msra.mxu1 %v2084_v57  ;;  %945 = vmatprep.subr.bf16.mxu0 %v2089_v58 }
  0x9b   :  { %986 = vmatprep.subr.bf16.mxu1 %v2092_v59 }
  0x9d   :  { %946 = vmatpush1.bf16.msra.mxu0 %v2087_v60 }
  0x9e   :  { %987 = vmatpush1.bf16.msra.mxu1 %v2090_v61  ;;  %947 = vmatprep.subr.bf16.mxu0 %v2095_v62 }
  0x9f   :  { %988 = vmatprep.subr.bf16.mxu1 %v2098_v63  ;;  %v1044_v63 = vsub.s32 2, %v1035_v39 }
  0xa1   :  { %948 = vmatpush1.bf16.msra.mxu0 %v2093_v0  ;;  %v1048_v0 = vsub.s32 3, %v1035_v39 }
  0xa2   :  { %989 = vmatpush1.bf16.msra.mxu1 %v2096_v1  ;;  %949 = vmatprep.subr.bf16.mxu0 %v2101_v2  ;;  %v1045_v1 = vrot.slane %v1032_v41, %v1044_v63 }
  0xa3   :  { %990 = vmatprep.subr.bf16.mxu1 %v2104_v3 }
  0xa5   :  { %950 = vmatpush1.bf16.msra.mxu0 %v2099_v4  ;;  %v1049_v4 = vrot.slane %v1032_v41, %v1048_v0 }
  0xa6   :  { %991 = vmatpush1.bf16.msra.mxu1 %v2102_v5  ;;  %1810 = vmatprep.subr.bf16.mxu0 %v2105_v8 }
  0xa7   :  { %1832 = vmatprep.subr.bf16.mxu1 %v2121_v22  ;;  %v2227_v22 = vmov 0.0  }
  0xa8   :  { %952 = vmatmul.mubr.bf16.vlgmr.msra.gmra.mrb[4].mxu0 %v2298_v6  ;;  %v2116_v6 = vld [vmem:[#allocation6 + $0x28] sm:$0xff]  }
  0xa9   :  { %993 = vmatmul.mubr.bf16.vlgmr.msra.gmra.mrb[4].mxu1 %v2300_v7  ;;  %1811 = vmatpush3.bf16.msra.mxu0 %v2106_v9  ;;  %v2117_v7 = vld [vmem:[#allocation6 + $0x70] sm:$0xff]  }
  0xaa   :  { %1812 = vmatprep.subr.bf16.mxu0 %v2107_v10  ;;  %1833 = vmatpush3.bf16.msra.mxu1 %v2122_v23  ;;  %v2138_v23 = vld [vmem:[%s2370_s3 + $0x8] sm:$0xff]  }
  0xab   :  { %1834 = vmatprep.subr.bf16.mxu1 %v2123_v24  ;;  %v2139_v24 = vld [vmem:[%s2370_s3 + $0x10] sm:$0xff]  }
  0xad   :  { %1813 = vmatpush3.bf16.msra.mxu0 %v2108_v11 }
  0xae   :  { %1814 = vmatprep.subr.bf16.mxu0 %v2109_v12  ;;  %1835 = vmatpush3.bf16.msra.mxu1 %v2124_v25  ;;  %v2140_v25 = vld [vmem:[%s2370_s3 + $0x18] sm:$0xff]  }
  0xaf   :  { %1836 = vmatprep.subr.bf16.mxu1 %v2125_v26  ;;  %v2141_v26 = vld [vmem:[%s2370_s3 + $0x20] sm:$0xff]  }
  0xb1   :  { %1815 = vmatpush3.bf16.msra.mxu0 %v2110_v13 }
  0xb2   :  { %1816 = vmatprep.subr.bf16.mxu0 %v2111_v14  ;;  %1837 = vmatpush3.bf16.msra.mxu1 %v2126_v27  ;;  %v2142_v27 = vld [vmem:[%s2370_s3 + $0x28] sm:$0xff]  }
  0xb3   :  { %1838 = vmatprep.subr.bf16.mxu1 %v2127_v28  ;;  %v2143_v28 = vld [vmem:[%s2370_s3 + $0x30] sm:$0xff]  }
  0xb5   :  { %1817 = vmatpush3.bf16.msra.mxu0 %v2112_v15 }
  0xb6   :  { %1818 = vmatprep.subr.bf16.mxu0 %v2113_v16  ;;  %1839 = vmatpush3.bf16.msra.mxu1 %v2128_v29  ;;  %v2144_v29 = vld [vmem:[%s2370_s3 + $0x38] sm:$0xff]  }
  0xb7   :  { %1840 = vmatprep.subr.bf16.mxu1 %v2129_v30  ;;  %v2145_v30 = vld [vmem:[%s2371_s4] sm:$0xff]  }
  0xb9   :  { %1819 = vmatpush3.bf16.msra.mxu0 %v2114_v17 }
  0xba   :  { %1820 = vmatprep.subr.bf16.mxu0 %v2115_v18  ;;  %1841 = vmatpush3.bf16.msra.mxu1 %v2130_v31  ;;  %v2146_v31 = vld [vmem:[%s2371_s4 + $0x8] sm:$0xff]  }
  0xbb   :  { %1842 = vmatprep.subr.bf16.mxu1 %v2131_v32 }
  0xbd   :  { %1821 = vmatpush3.bf16.msra.mxu0 %v2116_v6 }
  0xbe   :  { %1822 = vmatprep.subr.bf16.mxu0 %v2117_v7  ;;  %1843 = vmatpush3.bf16.msra.mxu1 %v2132_v33 }
  0xbf   :  { %1844 = vmatprep.subr.bf16.mxu1 %v2133_v34 }
  0xc1   :  { %1823 = vmatpush3.bf16.msra.mxu0 %v2118_v19 }
  0xc2   :  { %1824 = vmatprep.subr.bf16.mxu0 %v2119_v20  ;;  %1845 = vmatpush3.bf16.msra.mxu1 %v2134_v35 }
  0xc3   :  { %1846 = vmatprep.subr.bf16.mxu1 %v2135_v36 }
  0xc5   :  { %1825 = vmatpush3.bf16.msra.mxu0 %v2120_v21  ;;  %v2137_v21 = vld [vmem:[%s2370_s3] sm:$0xff]  }
  0xc6   :  { %1847 = vmatpush3.bf16.msra.mxu1 %v2136_v37  ;;  %1868 = vmatprep.subr.bf16.mxu0 %v2227_v22  ;;  %v1762_v37 = vld [vmem:[%s2372_s5 + $0x1] ss:$0 sm:$0xff] }
  0xc7   :  { %1888 = vmatprep.subr.bf16.mxu1 %v2227_v22 }
 0x13b   :  { %v871_v44 = vpop.f32.mrb[0].mxu0 }
 0x13c   :  { %v912_v45 = vpop.f32.mrb[0].mxu1  ;;  %v873_v48 = vpop.f32.mrb[1].mxu0 }
 0x13d   :  { %v913_v47 = vadd.f32 %v912_v45, %v871_v44  ;;  %v914_v49 = vpop.f32.mrb[1].mxu1  ;;  %v875_v51 = vpop.f32.mrb[2].mxu0 }
 0x13e   :  { %v915_v50 = vadd.f32 %v914_v49, %v873_v48  ;;  %v916_v52 = vpop.f32.mrb[2].mxu1  ;;  %v876_v54 = vpop.f32.mrb[3].mxu0  ;;  %v2147_v48 = vld [vmem:[%s2371_s4 + $0x10] sm:$0xff]   ;;  %v2148_v49 = vld [vmem:[%s2371_s4 + $0x18] sm:$0xff]   ;;  %s2229_s4 = smov [#allocation8]  }
 0x13f   :  { %v1054_v53 = vadd.f32 %v1037_v43, %v913_v47  ;;  %v917_v55 = vpop.f32.mrb[3].mxu1  ;;  %s1620_s30 = sshll.u32 %s2229_s4, 4  ;;  %s1621_s30 = int_to_ptr.vmem [resolvable:$true] %s1620_s30 }
 0x140   :  { %v1055_v56 = vadd.f32 %v1041_v46, %v915_v50  ;;  %v1795_v50 = vld [vmem:[%s2372_s5 + $0x2] ss:$0 sm:$0xff]  ;;  %s2193_s7 = scalar_lea.vmem %s1621_s30, 128  ;;  %p2198_p3 = scmp.lt.s32.totalorder %s1621_s30, %s1621_s30 }
 0x141   :  { %vm1058_vm0 = vcmp.gt.f32.partialorder %v1054_v53, 0.0  ;;  %v1062_v57 = vmul.f32 0.1, %v1054_v53  ;;  %p2194_p2 = scmp.ne.s32.totalorder %s1621_s30, %s2193_s7  ;;  %p2199_p4 = scmp.lt.s32.totalorder %s2193_s7, %s2193_s7 }
 0x142   :  { %v1063_v58 = vmul.f32 0.1, %v1055_v56  ;;  %vm1059_vm1 = vcmp.gt.f32.partialorder %v1055_v56, 0.0 }
 0x143   :  { %v1066_v59 = vsel %vm1058_vm0, %v1054_v53, %v1062_v57  ;;  %p2200_p5 = por %p2199_p4, %p2198_p3 }
 0x144   :  { %v1067_v60 = vsel %vm1059_vm1, %v1055_v56, %v1063_v58  ;;  %v1070_v62 = vpack.c.bf16 %v1066_v59, %v1066_v59  ;;  %v1804_v59 = vld [vmem:[%s2372_s5 + $0x3] ss:$0 sm:$0xff] }
 0x145   :  { %v1071_v61 = vpack.c.bf16 %v1067_v60, %v1067_v60  ;;  %p2201_p6 = pnand %p2200_p5, %p2194_p2 }
 0x147   :  { %1367 = vmatprep.mubr.bf16.mxu0 %v1071_v61 }
 0x148   :  { %1368 = vmatmul.mubr.bf16.vlgmr.msra.gmra.mrb[8].mxu0 %v1070_v62 }
 0x149   :  { %1869 = vmatpush3.bf16.msra.mxu0 %v2137_v21  ;;  %1884 = vmatprep.mubr.msk.bf16.mxu0 %vm2228_vm4, %v2227_v22 }
 0x14a   :  { %1870 = vmatprep.subr.bf16.mxu0 %v2227_v22 }
 0x14d   :  { %1871 = vmatpush3.bf16.msra.mxu0 %v2138_v23 }
 0x14e   :  { %1872 = vmatprep.subr.bf16.mxu0 %v2227_v22 }
 0x151   :  { %1873 = vmatpush3.bf16.msra.mxu0 %v2139_v24 }
 0x152   :  { %1874 = vmatprep.subr.bf16.mxu0 %v2227_v22 }
 0x155   :  { %1875 = vmatpush3.bf16.msra.mxu0 %v2140_v25 }
 0x156   :  { %1876 = vmatprep.subr.bf16.mxu0 %v2227_v22 }
 0x159   :  { %1877 = vmatpush3.bf16.msra.mxu0 %v2141_v26 }
 0x15a   :  { %1878 = vmatprep.subr.bf16.mxu0 %v2227_v22 }
 0x15d   :  { %1879 = vmatpush3.bf16.msra.mxu0 %v2142_v27 }
 0x15e   :  { %1880 = vmatprep.subr.bf16.mxu0 %v2227_v22 }
 0x161   :  { %1881 = vmatpush3.bf16.msra.mxu0 %v2143_v28 }
 0x162   :  { %1882 = vmatprep.subr.bf16.mxu0 %v2227_v22 }
 0x165   :  { %1883 = vmatpush3.bf16.msra.mxu0 %v2144_v29 }
 0x17b   :  { %v953_v2 = vpop.f32.mrb[4].mxu0 }
 0x17c   :  { %v994_v3 = vpop.f32.mrb[4].mxu1  ;;  %v955_v8 = vpop.f32.mrb[5].mxu0 }
 0x17d   :  { %v995_v5 = vadd.f32 %v994_v3, %v953_v2  ;;  %v996_v9 = vpop.f32.mrb[5].mxu1  ;;  %v957_v11 = vpop.f32.mrb[6].mxu0 }
 0x17e   :  { %v997_v10 = vadd.f32 %v996_v9, %v955_v8  ;;  %v998_v12 = vpop.f32.mrb[6].mxu1  ;;  %v958_v14 = vpop.f32.mrb[7].mxu0 }
 0x17f   :  { %v1056_v13 = vadd.f32 %v1045_v1, %v995_v5  ;;  %v999_v15 = vpop.f32.mrb[7].mxu1 }
 0x180   :  { %v1057_v16 = vadd.f32 %v1049_v4, %v997_v10 }
 0x181   :  { %vm1060_vm2 = vcmp.gt.f32.partialorder %v1056_v13, 0.0  ;;  %v1064_v17 = vmul.f32 0.1, %v1056_v13 }
 0x182   :  { %v1065_v18 = vmul.f32 0.1, %v1057_v16  ;;  %vm1061_vm3 = vcmp.gt.f32.partialorder %v1057_v16, 0.0 }
 0x183   :  { %v1068_v6 = vsel %vm1060_vm2, %v1056_v13, %v1064_v17 }
 0x184   :  { %v1069_v7 = vsel %vm1061_vm3, %v1057_v16, %v1065_v18  ;;  %v1072_v20 = vpack.c.bf16 %v1068_v6, %v1068_v6 }
 0x185   :  { %v1073_v19 = vpack.c.bf16 %v1069_v7, %v1069_v7 }
 0x187   :  { %1407 = vmatprep.mubr.bf16.mxu1 %v1073_v19 }
 0x188   :  { %1408 = vmatmul.mubr.bf16.vlgmr.msra.gmra.mrb[8].mxu1 %v1072_v20 }
 0x189   :  { %1896 = vmatprep.mubr.msk.bf16.mxu1 %vm2228_vm4, %v2227_v22  ;;  %1889 = vmatpush3.bf16.msra.mxu1 %v2145_v30 }
 0x18a   :  { %1890 = vmatprep.subr.bf16.mxu1 %v2227_v22 }
 0x18d   :  { %1891 = vmatpush3.bf16.msra.mxu1 %v2146_v31 }
 0x18e   :  { %1892 = vmatprep.subr.bf16.mxu1 %v2227_v22 }
 0x191   :  { %1893 = vmatpush3.bf16.msra.mxu1 %v2147_v48 }
 0x192   :  { %1894 = vmatprep.subr.bf16.mxu1 %v2227_v22 }
 0x195   :  { %1895 = vmatpush3.bf16.msra.mxu1 %v2148_v49 }
 0x21b   :  { %v1826_v32 = vpop.f32.mrb[8].mxu0 }
 0x21c   :  { %v1827_v33 = vpop.f32.mrb[9].mxu0 }
 0x21d   :  { %v1828_v34 = vadd.f32 %v1827_v33, %v1826_v32  ;;  %v1829_v35 = vpop.f32.mrb[10].mxu0 }
 0x21e   :  { %v1830_v36 = vpop.f32.mrb[11].mxu0 }
 0x21f   :  { %v1370_v40 = vadd.f32 %v1828_v34, %v1762_v37 }
 0x25b   :  { %v1848_v38 = vpop.f32.mrb[8].mxu1 }
 0x25c   :  { %v1849_v39 = vpop.f32.mrb[9].mxu1 }
 0x25d   :  { %v1850_v41 = vadd.f32 %v1849_v39, %v1848_v38  ;;  %v1851_v42 = vpop.f32.mrb[10].mxu1 }
 0x25e   :  { %v1852_v43 = vpop.f32.mrb[11].mxu1 }
 0x25f   :  { %v1410_v44 = vadd.f32 %v1850_v41, %v1370_v40 }
 0x261   :  { %vm1415_vm5 = vcmp.gt.f32.partialorder %v1410_v44, 0.0  ;;  %v1416_v45 = vmul.f32 0.1, %v1410_v44 }
 0x263   :  { %v1417_v46 = vsel %vm1415_vm5, %v1410_v44, %v1416_v45 }
 0x264   :  { %v1418_v47 = vpack.c.bf16 %v1417_v46, %v1417_v46 }
 0x266   :  { %1885 = vmatmul.mubr.bf16.vlgmr.msra.gmra.mrb[12].mxu0 %v1418_v47 }
 0x339   :  { %v1522_v51 = vpop.f32.mrb[12].mxu0 }
 0x33a   :  { %v1523_v52 = vadd.f32 %v1795_v50, %v1522_v51  ;;  %v1886_v53 = vpop.f32.mrb[13].mxu0 }
 0x33b   :  { %v1525_v54 = vpop.f32.mrb[14].mxu0 }
 0x33c   :  { %vm1528_vm6 = vcmp.gt.f32.partialorder %v1523_v52, 0.0  ;;  %v1529_v55 = vmul.f32 0.1, %v1523_v52  ;;  %v1887_v56 = vpop.f32.mrb[15].mxu0 }
 0x33e   :  { %v1530_v57 = vsel %vm1528_vm6, %v1523_v52, %v1529_v55 }
 0x33f   :  { %v1531_v58 = vpack.c.bf16 %v1530_v57, %v1530_v57 }
 0x341   :  { %1897 = vmatmul.mubr.msk.bf16.vlgmr.msra.gmra.mrb[12].mxu1 %vm1569_vm7, %v1531_v58 }
 0x414   :  { %v1607_v60 = vpop.f32.mrb[12].mxu1 }
 0x415   :  { %v1608_v61 = vadd.f32 %v1804_v59, %v1607_v60  ;;  %v1898_v62 = vpop.f32.mrb[13].mxu1 }
 0x416   :  { %v1610_v63 = vpop.f32.mrb[14].mxu1 }
 0x417   :  { %1613 = vst [vmem:[#allocation8] sm:$0xff] %v1608_v61  ;;  %v1899_v0 = vpop.f32.mrb[15].mxu1 }
 0x418   :  { %2204 = shalt.err (!%p2201_p6)
}
 0x419   :  { %s2205_s5 = scalar_lea.hbm %s2373_s6, 128 }
 0x41a   :  { %p2206_p7 = scmp.ne.s32.totalorder %s2373_s6, %s2205_s5  ;;  %p2209_p8 = scmp.lt.u32.totalorder %s2205_s5, %s2373_s6 }
 0x41c   :  { %p2211_p9 = pnand %p2209_p8, %p2206_p7 }
 0x41e   :  { %2214 = shalt.err (!%p2211_p9)
}
 0x41f   :  { %1623 = dma.vmem_to_hbm [thread:$0]  %s1621_s30, 128, %s2373_s6, [#allocation5]  }
 0x420   :  { %2219 = dma.done.wait [#allocation5], 128  }
 0x421   :  { %2220 = vsyncadd [#allocation5], 4294967168 }
 0x422   :  { %1627 = vsyncpa [#allocation4], 1 }
 0x423   :  { %1628 = vsyncpa [#allocation7], 1 }
 0x424   :  { %1629 = vsyncpa [#allocation5], 1 }

// kernel: tpu_custom_call.1
= control target key start
LH: loop header
LB: loop body
LE: loop exit
PB: predicated region body
PF: predicated region fallthrough
CT: control target
= control target key end

     0   :  { %11 = vsyncpa [#allocation4], 0  ;;  %s2367_s0 = inlined_call_operand.vmem [shape: bf16[8,512], index: 0, kind: input, shape index: {}]   ;;  %s2368_s1 = inlined_call_operand.hbm [shape: bf16[512,512], index: 1, kind: input, shape index: {}]   ;;  %s2369_s2 = inlined_call_operand.hbm [shape: bf16[512,128], index: 2, kind: input, shape index: {}]   ;;  %s2370_s3 = inlined_call_operand.vmem [shape: bf16[128,64], index: 3, kind: input, shape index: {}]   ;;  %s2371_s4 = inlined_call_operand.vmem [shape: bf16[64,128], index: 4, kind: input, shape index: {}]   ;;  %s2372_s5 = inlined_call_operand.vmem [shape: f32[4,512], index: 5, kind: input, shape index: {}]   ;;  %s2373_s6 = inlined_call_operand.hbm [shape: f32[8,128], index: 6, kind: output, shape index: {}]  }
   0x1   :  { %12 = vsyncpa [#allocation7], 0 }
   0x2   :  { %13 = vsyncpa [#allocation5], 0  ;;  %s2221_s21 = smov [#allocation3]   ;;  %s2149_s25 = scalar_lea.hbm %s2368_s1, 16384 }
   0x3   :  { %s21_s22 = sshll.u32 %s2221_s21, 4  ;;  %p2150_p0 = scmp.ne.s32.totalorder %s2368_s1, %s2149_s25  ;;  %s22_s22 = int_to_ptr.vmem [resolvable:$true] %s21_s22 }
   0x4   :  { %p2153_p1 = scmp.lt.u32.totalorder %s2149_s25, %s2368_s1 }
   0x6   :  { %p2155_p2 = pnand %p2153_p1, %p2150_p0 }
   0x8   :  { %2158 = shalt.err (!%p2155_p2)
}
   0x9   :  { %s2159_s30 = scalar_lea.vmem %s22_s22, 16384  ;;  %p2164_p4 = scmp.lt.s32.totalorder %s22_s22, %s22_s22 }
   0xa   :  { %p2160_p3 = scmp.ne.s32.totalorder %s22_s22, %s2159_s30  ;;  %p2165_p5 = scmp.lt.s32.totalorder %s2159_s30, %s2159_s30 }
   0xc   :  { %p2166_p6 = por %p2165_p5, %p2164_p4 }
   0xe   :  { %p2167_p7 = pnand %p2166_p6, %p2160_p3 }
  0x10   :  { %2170 = shalt.err (!%p2167_p7)
}
  0x11   :  { %s2222_s7 = smov 256   ;;  %s2223_s8 = smov 16  }
  0x12   :  { %27 = dma.hbm_to_vmem [thread:$0]  %s2368_s1, 16384, %s22_s22, [#allocation4], %s2222_s7, %s2222_s7, %s2223_s8  }
  0x13   :  { %s2224_s11 = smov [#allocation6]   ;;  %s2171_s15 = scalar_lea.hbm %s2369_s2, 4096 }
  0x14   :  { %s33_s12 = sshll.u32 %s2224_s11, 4  ;;  %p2172_p8 = scmp.ne.s32.totalorder %s2369_s2, %s2171_s15  ;;  %s34_s12 = int_to_ptr.vmem [resolvable:$true] %s33_s12 }
  0x15   :  { %p2175_p9 = scmp.lt.u32.totalorder %s2171_s15, %s2369_s2 }
  0x17   :  { %p2177_p10 = pnand %p2175_p9, %p2172_p8 }
  0x19   :  { %2180 = shalt.err (!%p2177_p10)
}
  0x1a   :  { %s2181_s20 = scalar_lea.vmem %s34_s12, 4096  ;;  %p2186_p12 = scmp.lt.s32.totalorder %s34_s12, %s34_s12 }
  0x1b   :  { %p2182_p11 = scmp.ne.s32.totalorder %s34_s12, %s2181_s20  ;;  %p2187_p13 = scmp.lt.s32.totalorder %s2181_s20, %s2181_s20 }
  0x1d   :  { %p2188_p0 = por %p2187_p13, %p2186_p12 }
  0x1f   :  { %p2189_p1 = pnand %p2188_p0, %p2182_p11 }
  0x21   :  { %2192 = shalt.err (!%p2189_p1)
}
  0x22   :  { %s2225_s1 = smov 64   ;;  %s2226_s21 = smov 4  }
  0x23   :  { %39 = dma.hbm_to_vmem [thread:$0]  %s2369_s2, 4096, %s34_s12, [#allocation7], %s2225_s1, %s2225_s1, %s2226_s21  }
  0x24   :  { %2215 = dma.done.wait [#allocation4], 16384  }
  0x25   :  { %2216 = vsyncadd [#allocation4], 4294950912 }
  0x26   :  { %2217 = dma.done.wait [#allocation7], 4096  }
  0x27   :  { %2218 = vsyncadd [#allocation7], 4294963200  ;;  %v1909_v0 = vld [vmem:[#allocation3 + $0x4] ss:$16 sps:$4 sm:$0xff]   ;;  %v1913_v2 = vld [vmem:[#allocation3] ss:$16 sps:$4 sm:$0xff]  }
  0x28   :  { %v1911_v1 = vld [vmem:[#allocation3 + $0x204] ss:$16 sps:$4 sm:$0xff]   ;;  %837 = vmatprep.subr.bf16.mxu0 %v1909_v0  ;;  %v1914_v3 = vld [vmem:[#allocation3 + $0x200] ss:$16 sps:$4 sm:$0xff]   ;;  %v54_v48 = vld [vmem:[%s2367_s0 + $0x8] sm:$0xff]  ;;  %vm2228_vm4 = vmmov 0  }
  0x29   :  { %878 = vmatprep.subr.bf16.mxu1 %v1911_v1  ;;  %v1915_v4 = vld [vmem:[#allocation3 + $0x24] ss:$16 sps:$4 sm:$0xff]   ;;  %838 = vmatpush1.bf16.msra.mxu0 %v1913_v2  ;;  %v1919_v6 = vld [vmem:[#allocation3 + $0x20] ss:$16 sps:$4 sm:$0xff]   ;;  %v1633_v51 = vcombine.high %v54_v48, %v54_v48  ;;  %vm1569_vm7 = vcmask 523264  }
  0x2a   :  { %879 = vmatpush1.bf16.msra.mxu1 %v1914_v3  ;;  %v1917_v5 = vld [vmem:[#allocation3 + $0x224] ss:$16 sps:$4 sm:$0xff]   ;;  %839 = vmatprep.subr.bf16.mxu0 %v1915_v4  ;;  %v1920_v7 = vld [vmem:[#allocation3 + $0x220] ss:$16 sps:$4 sm:$0xff]   ;;  %v2011_v4 = vld [vmem:[#allocation3 + $0xc] ss:$16 sps:$4 sm:$0xff]  }
  0x2b   :  { %880 = vmatprep.subr.bf16.mxu1 %v1917_v5  ;;  %v1921_v8 = vld [vmem:[#allocation3 + $0x44] ss:$16 sps:$4 sm:$0xff]   ;;  %v1925_v10 = vld [vmem:[#allocation3 + $0x40] ss:$16 sps:$4 sm:$0xff]   ;;  %910 = vmatprep.mubr.bf16.mxu1 %v1633_v51  ;;  %v2014_v5 = vld [vmem:[#allocation3 + $0x20c] ss:$16 sps:$4 sm:$0xff]  }
  0x2c   :  { %v1923_v9 = vld [vmem:[#allocation3 + $0x244] ss:$16 sps:$4 sm:$0xff]   ;;  %v1926_v11 = vld [vmem:[#allocation3 + $0x240] ss:$16 sps:$4 sm:$0xff]  }
  0x2d   :  { %840 = vmatpush1.bf16.msra.mxu0 %v1919_v6  ;;  %v1927_v12 = vld [vmem:[#allocation3 + $0x64] ss:$16 sps:$4 sm:$0xff]   ;;  %v1931_v14 = vld [vmem:[#allocation3 + $0x60] ss:$16 sps:$4 sm:$0xff]  }
  0x2e   :  { %881 = vmatpush1.bf16.msra.mxu1 %v1920_v7  ;;  %841 = vmatprep.subr.bf16.mxu0 %v1921_v8  ;;  %v1929_v13 = vld [vmem:[#allocation3 + $0x264] ss:$16 sps:$4 sm:$0xff]   ;;  %v1932_v15 = vld [vmem:[#allocation3 + $0x260] ss:$16 sps:$4 sm:$0xff]   ;;  %v2300_v7 = vcombine.low %v54_v48, %v54_v48  ;;  %v2009_v8 = vld [vmem:[#allocation3 + $0x8] ss:$16 sps:$4 sm:$0xff]  }
  0x2f   :  { %882 = vmatprep.subr.bf16.mxu1 %v1923_v9  ;;  %v1933_v16 = vld [vmem:[#allocation3 + $0x84] ss:$16 sps:$4 sm:$0xff]   ;;  %v1937_v18 = vld [vmem:[#allocation3 + $0x80] ss:$16 sps:$4 sm:$0xff]   ;;  %v2012_v9 = vld [vmem:[#allocation3 + $0x208] ss:$16 sps:$4 sm:$0xff]  }
  0x30   :  { %v1935_v17 = vld [vmem:[#allocation3 + $0x284] ss:$16 sps:$4 sm:$0xff]   ;;  %v1938_v19 = vld [vmem:[#allocation3 + $0x280] ss:$16 sps:$4 sm:$0xff]   ;;  %v2069_v48 = vld [vmem:[#allocation3 + $0x148] ss:$16 sps:$4 sm:$0xff]  }
  0x31   :  { %842 = vmatpush1.bf16.msra.mxu0 %v1925_v10  ;;  %v1939_v20 = vld [vmem:[#allocation3 + $0xa4] ss:$16 sps:$4 sm:$0xff]   ;;  %v1943_v22 = vld [vmem:[#allocation3 + $0xa0] ss:$16 sps:$4 sm:$0xff]   ;;  %v2017_v10 = vld [vmem:[#allocation3 + $0x2c] ss:$16 sps:$4 sm:$0xff]  }
  0x32   :  { %883 = vmatpush1.bf16.msra.mxu1 %v1926_v11  ;;  %843 = vmatprep.subr.bf16.mxu0 %v1927_v12  ;;  %v1941_v21 = vld [vmem:[#allocation3 + $0x2a4] ss:$16 sps:$4 sm:$0xff]   ;;  %v1944_v23 = vld [vmem:[#allocation3 + $0x2a0] ss:$16 sps:$4 sm:$0xff]   ;;  %v2020_v11 = vld [vmem:[#allocation3 + $0x22c] ss:$16 sps:$4 sm:$0xff]  }
  0x33   :  { %884 = vmatprep.subr.bf16.mxu1 %v1929_v13  ;;  %v1945_v24 = vld [vmem:[#allocation3 + $0xc4] ss:$16 sps:$4 sm:$0xff]   ;;  %v1949_v26 = vld [vmem:[#allocation3 + $0xc0] ss:$16 sps:$4 sm:$0xff]   ;;  %v2015_v12 = vld [vmem:[#allocation3 + $0x28] ss:$16 sps:$4 sm:$0xff]  }
  0x34   :  { %v1947_v25 = vld [vmem:[#allocation3 + $0x2c4] ss:$16 sps:$4 sm:$0xff]   ;;  %v1950_v27 = vld [vmem:[#allocation3 + $0x2c0] ss:$16 sps:$4 sm:$0xff]   ;;  %v2018_v13 = vld [vmem:[#allocation3 + $0x228] ss:$16 sps:$4 sm:$0xff]  }
  0x35   :  { %844 = vmatpush1.bf16.msra.mxu0 %v1931_v14  ;;  %v1951_v28 = vld [vmem:[#allocation3 + $0xe4] ss:$16 sps:$4 sm:$0xff]   ;;  %v1955_v30 = vld [vmem:[#allocation3 + $0xe0] ss:$16 sps:$4 sm:$0xff]   ;;  %v2023_v14 = vld [vmem:[#allocation3 + $0x4c] ss:$16 sps:$4 sm:$0xff]  }
  0x36   :  { %885 = vmatpush1.bf16.msra.mxu1 %v1932_v15  ;;  %845 = vmatprep.subr.bf16.mxu0 %v1933_v16  ;;  %v1953_v29 = vld [vmem:[#allocation3 + $0x2e4] ss:$16 sps:$4 sm:$0xff]   ;;  %v1956_v31 = vld [vmem:[#allocation3 + $0x2e0] ss:$16 sps:$4 sm:$0xff]   ;;  %v2026_v15 = vld [vmem:[#allocation3 + $0x24c] ss:$16 sps:$4 sm:$0xff]  }
  0x37   :  { %886 = vmatprep.subr.bf16.mxu1 %v1935_v17  ;;  %v1957_v32 = vld [vmem:[#allocation3 + $0x104] ss:$16 sps:$4 sm:$0xff]   ;;  %v1961_v34 = vld [vmem:[#allocation3 + $0x100] ss:$16 sps:$4 sm:$0xff]   ;;  %v2021_v16 = vld [vmem:[#allocation3 + $0x48] ss:$16 sps:$4 sm:$0xff]  }
  0x38   :  { %v1959_v33 = vld [vmem:[#allocation3 + $0x304] ss:$16 sps:$4 sm:$0xff]   ;;  %v1962_v35 = vld [vmem:[#allocation3 + $0x300] ss:$16 sps:$4 sm:$0xff]   ;;  %v2024_v17 = vld [vmem:[#allocation3 + $0x248] ss:$16 sps:$4 sm:$0xff]  }
  0x39   :  { %846 = vmatpush1.bf16.msra.mxu0 %v1937_v18  ;;  %v1963_v36 = vld [vmem:[#allocation3 + $0x124] ss:$16 sps:$4 sm:$0xff]   ;;  %v1967_v38 = vld [vmem:[#allocation3 + $0x120] ss:$16 sps:$4 sm:$0xff]   ;;  %v2029_v18 = vld [vmem:[#allocation3 + $0x6c] ss:$16 sps:$4 sm:$0xff]  }
  0x3a   :  { %887 = vmatpush1.bf16.msra.mxu1 %v1938_v19  ;;  %847 = vmatprep.subr.bf16.mxu0 %v1939_v20  ;;  %v1965_v37 = vld [vmem:[#allocation3 + $0x324] ss:$16 sps:$4 sm:$0xff]   ;;  %v1968_v39 = vld [vmem:[#allocation3 + $0x320] ss:$16 sps:$4 sm:$0xff]   ;;  %v2032_v19 = vld [vmem:[#allocation3 + $0x26c] ss:$16 sps:$4 sm:$0xff]  }
  0x3b   :  { %888 = vmatprep.subr.bf16.mxu1 %v1941_v21  ;;  %v1969_v40 = vld [vmem:[#allocation3 + $0x144] ss:$16 sps:$4 sm:$0xff]   ;;  %v1973_v42 = vld [vmem:[#allocation3 + $0x140] ss:$16 sps:$4 sm:$0xff]   ;;  %v2027_v20 = vld [vmem:[#allocation3 + $0x68] ss:$16 sps:$4 sm:$0xff]  }
  0x3c   :  { %v1971_v41 = vld [vmem:[#allocation3 + $0x344] ss:$16 sps:$4 sm:$0xff]   ;;  %v1974_v43 = vld [vmem:[#allocation3 + $0x340] ss:$16 sps:$4 sm:$0xff]   ;;  %v2030_v21 = vld [vmem:[#allocation3 + $0x268] ss:$16 sps:$4 sm:$0xff]  }
  0x3d   :  { %848 = vmatpush1.bf16.msra.mxu0 %v1943_v22  ;;  %v1975_v44 = vld [vmem:[#allocation3 + $0x164] ss:$16 sps:$4 sm:$0xff]   ;;  %v1979_v49 = vld [vmem:[#allocation3 + $0x160] ss:$16 sps:$4 sm:$0xff]   ;;  %v2035_v22 = vld [vmem:[#allocation3 + $0x8c] ss:$16 sps:$4 sm:$0xff]  }
  0x3e   :  { %889 = vmatpush1.bf16.msra.mxu1 %v1944_v23  ;;  %849 = vmatprep.subr.bf16.mxu0 %v1945_v24  ;;  %v1977_v45 = vld [vmem:[#allocation3 + $0x364] ss:$16 sps:$4 sm:$0xff]   ;;  %v1980_v50 = vld [vmem:[#allocation3 + $0x360] ss:$16 sps:$4 sm:$0xff]   ;;  %v2038_v23 = vld [vmem:[#allocation3 + $0x28c] ss:$16 sps:$4 sm:$0xff]  }
  0x3f   :  { %890 = vmatprep.subr.bf16.mxu1 %v1947_v25  ;;  %v53_v46 = vld [vmem:[%s2367_s0] sm:$0xff]  ;;  %v2033_v24 = vld [vmem:[#allocation3 + $0x88] ss:$16 sps:$4 sm:$0xff]  }
  0x40   :  { %v2292_v47 = vcombine.high %v53_v46, %v53_v46  ;;  %v1981_v52 = vld [vmem:[#allocation3 + $0x184] ss:$16 sps:$4 sm:$0xff]   ;;  %v1985_v54 = vld [vmem:[#allocation3 + $0x180] ss:$16 sps:$4 sm:$0xff]   ;;  %v2298_v6 = vcombine.low %v53_v46, %v53_v46  ;;  %v2036_v25 = vld [vmem:[#allocation3 + $0x288] ss:$16 sps:$4 sm:$0xff]  }
  0x41   :  { %850 = vmatpush1.bf16.msra.mxu0 %v1949_v26  ;;  %v1983_v53 = vld [vmem:[#allocation3 + $0x384] ss:$16 sps:$4 sm:$0xff]   ;;  %v1986_v55 = vld [vmem:[#allocation3 + $0x380] ss:$16 sps:$4 sm:$0xff]   ;;  %v2041_v26 = vld [vmem:[#allocation3 + $0xac] ss:$16 sps:$4 sm:$0xff]  }
  0x42   :  { %891 = vmatpush1.bf16.msra.mxu1 %v1950_v27  ;;  %851 = vmatprep.subr.bf16.mxu0 %v1951_v28  ;;  %v1987_v56 = vld [vmem:[#allocation3 + $0x1a4] ss:$16 sps:$4 sm:$0xff]   ;;  %v1991_v58 = vld [vmem:[#allocation3 + $0x1a0] ss:$16 sps:$4 sm:$0xff]   ;;  %v2044_v27 = vld [vmem:[#allocation3 + $0x2ac] ss:$16 sps:$4 sm:$0xff]  }
  0x43   :  { %892 = vmatprep.subr.bf16.mxu1 %v1953_v29  ;;  %869 = vmatprep.mubr.bf16.mxu0 %v2292_v47  ;;  %v1989_v57 = vld [vmem:[#allocation3 + $0x3a4] ss:$16 sps:$4 sm:$0xff]   ;;  %v1992_v59 = vld [vmem:[#allocation3 + $0x3a0] ss:$16 sps:$4 sm:$0xff]   ;;  %v2039_v28 = vld [vmem:[#allocation3 + $0xa8] ss:$16 sps:$4 sm:$0xff]  }
  0x44   :  { %v1993_v60 = vld [vmem:[#allocation3 + $0x1c4] ss:$16 sps:$4 sm:$0xff]   ;;  %v1997_v62 = vld [vmem:[#allocation3 + $0x1c0] ss:$16 sps:$4 sm:$0xff]   ;;  %v2042_v29 = vld [vmem:[#allocation3 + $0x2a8] ss:$16 sps:$4 sm:$0xff]  }
  0x45   :  { %852 = vmatpush1.bf16.msra.mxu0 %v1955_v30  ;;  %v1995_v61 = vld [vmem:[#allocation3 + $0x3c4] ss:$16 sps:$4 sm:$0xff]   ;;  %v1998_v63 = vld [vmem:[#allocation3 + $0x3c0] ss:$16 sps:$4 sm:$0xff]   ;;  %v2047_v30 = vld [vmem:[#allocation3 + $0xcc] ss:$16 sps:$4 sm:$0xff]  }
  0x46   :  { %893 = vmatpush1.bf16.msra.mxu1 %v1956_v31  ;;  %853 = vmatprep.subr.bf16.mxu0 %v1957_v32  ;;  %v1999_v0 = vld [vmem:[#allocation3 + $0x1e4] ss:$16 sps:$4 sm:$0xff]   ;;  %v2003_v2 = vld [vmem:[#allocation3 + $0x1e0] ss:$16 sps:$4 sm:$0xff]   ;;  %v2050_v31 = vld [vmem:[#allocation3 + $0x2cc] ss:$16 sps:$4 sm:$0xff]  }
  0x47   :  { %894 = vmatprep.subr.bf16.mxu1 %v1959_v33  ;;  %v2001_v1 = vld [vmem:[#allocation3 + $0x3e4] ss:$16 sps:$4 sm:$0xff]   ;;  %v2004_v3 = vld [vmem:[#allocation3 + $0x3e0] ss:$16 sps:$4 sm:$0xff]   ;;  %v2045_v32 = vld [vmem:[#allocation3 + $0xc8] ss:$16 sps:$4 sm:$0xff]  }
  0x48   :  { %v2048_v33 = vld [vmem:[#allocation3 + $0x2c8] ss:$16 sps:$4 sm:$0xff]   ;;  %v2071_v46 = vld [vmem:[#allocation3 + $0x14c] ss:$16 sps:$4 sm:$0xff]  }
  0x49   :  { %854 = vmatpush1.bf16.msra.mxu0 %v1961_v34  ;;  %v2053_v34 = vld [vmem:[#allocation3 + $0xec] ss:$16 sps:$4 sm:$0xff]  }
  0x4a   :  { %895 = vmatpush1.bf16.msra.mxu1 %v1962_v35  ;;  %855 = vmatprep.subr.bf16.mxu0 %v1963_v36  ;;  %v2056_v35 = vld [vmem:[#allocation3 + $0x2ec] ss:$16 sps:$4 sm:$0xff]   ;;  %v2051_v36 = vld [vmem:[#allocation3 + $0xe8] ss:$16 sps:$4 sm:$0xff]  }
  0x4b   :  { %896 = vmatprep.subr.bf16.mxu1 %v1965_v37  ;;  %v2054_v37 = vld [vmem:[#allocation3 + $0x2e8] ss:$16 sps:$4 sm:$0xff]  }
  0x4d   :  { %856 = vmatpush1.bf16.msra.mxu0 %v1967_v38  ;;  %v2059_v38 = vld [vmem:[#allocation3 + $0x10c] ss:$16 sps:$4 sm:$0xff]  }
  0x4e   :  { %897 = vmatpush1.bf16.msra.mxu1 %v1968_v39  ;;  %857 = vmatprep.subr.bf16.mxu0 %v1969_v40  ;;  %v2062_v39 = vld [vmem:[#allocation3 + $0x30c] ss:$16 sps:$4 sm:$0xff]   ;;  %v2057_v40 = vld [vmem:[#allocation3 + $0x108] ss:$16 sps:$4 sm:$0xff]  }
  0x4f   :  { %898 = vmatprep.subr.bf16.mxu1 %v1971_v41  ;;  %v2060_v41 = vld [vmem:[#allocation3 + $0x308] ss:$16 sps:$4 sm:$0xff]  }
  0x51   :  { %858 = vmatpush1.bf16.msra.mxu0 %v1973_v42  ;;  %v2065_v42 = vld [vmem:[#allocation3 + $0x12c] ss:$16 sps:$4 sm:$0xff]  }
  0x52   :  { %899 = vmatpush1.bf16.msra.mxu1 %v1974_v43  ;;  %859 = vmatprep.subr.bf16.mxu0 %v1975_v44  ;;  %v2068_v43 = vld [vmem:[#allocation3 + $0x32c] ss:$16 sps:$4 sm:$0xff]   ;;  %v2063_v44 = vld [vmem:[#allocation3 + $0x128] ss:$16 sps:$4 sm:$0xff]  }
  0x53   :  { %900 = vmatprep.subr.bf16.mxu1 %v1977_v45  ;;  %v2066_v45 = vld [vmem:[#allocation3 + $0x328] ss:$16 sps:$4 sm:$0xff]  }
  0x55   :  { %860 = vmatpush1.bf16.msra.mxu0 %v1979_v49  ;;  %v2072_v49 = vld [vmem:[#allocation3 + $0x348] ss:$16 sps:$4 sm:$0xff]  }
  0x56   :  { %901 = vmatpush1.bf16.msra.mxu1 %v1980_v50  ;;  %861 = vmatprep.subr.bf16.mxu0 %v1981_v52  ;;  %v2077_v50 = vld [vmem:[#allocation3 + $0x16c] ss:$16 sps:$4 sm:$0xff]   ;;  %v2075_v52 = vld [vmem:[#allocation3 + $0x168] ss:$16 sps:$4 sm:$0xff]  }
  0x57   :  { %902 = vmatprep.subr.bf16.mxu1 %v1983_v53  ;;  %v2078_v53 = vld [vmem:[#allocation3 + $0x368] ss:$16 sps:$4 sm:$0xff]  }
  0x59   :  { %862 = vmatpush1.bf16.msra.mxu0 %v1985_v54  ;;  %v2083_v54 = vld [vmem:[#allocation3 + $0x18c] ss:$16 sps:$4 sm:$0xff]  }
  0x5a   :  { %903 = vmatpush1.bf16.msra.mxu1 %v1986_v55  ;;  %863 = vmatprep.subr.bf16.mxu0 %v1987_v56  ;;  %v2086_v55 = vld [vmem:[#allocation3 + $0x38c] ss:$16 sps:$4 sm:$0xff]   ;;  %v2081_v56 = vld [vmem:[#allocation3 + $0x188] ss:$16 sps:$4 sm:$0xff]  }
  0x5b   :  { %904 = vmatprep.subr.bf16.mxu1 %v1989_v57  ;;  %v2084_v57 = vld [vmem:[#allocation3 + $0x388] ss:$16 sps:$4 sm:$0xff]  }
  0x5d   :  { %864 = vmatpush1.bf16.msra.mxu0 %v1991_v58  ;;  %v2089_v58 = vld [vmem:[#allocation3 + $0x1ac] ss:$16 sps:$4 sm:$0xff]  }
  0x5e   :  { %905 = vmatpush1.bf16.msra.mxu1 %v1992_v59  ;;  %865 = vmatprep.subr.bf16.mxu0 %v1993_v60  ;;  %v2092_v59 = vld [vmem:[#allocation3 + $0x3ac] ss:$16 sps:$4 sm:$0xff]   ;;  %v2087_v60 = vld [vmem:[#allocation3 + $0x1a8] ss:$16 sps:$4 sm:$0xff]  }
  0x5f   :  { %906 = vmatprep.subr.bf16.mxu1 %v1995_v61  ;;  %v2090_v61 = vld [vmem:[#allocation3 + $0x3a8] ss:$16 sps:$4 sm:$0xff]  }
  0x61   :  { %866 = vmatpush1.bf16.msra.mxu0 %v1997_v62  ;;  %v2095_v62 = vld [vmem:[#allocation3 + $0x1cc] ss:$16 sps:$4 sm:$0xff]  }
  0x62   :  { %907 = vmatpush1.bf16.msra.mxu1 %v1998_v63  ;;  %867 = vmatprep.subr.bf16.mxu0 %v1999_v0  ;;  %v2098_v63 = vld [vmem:[#allocation3 + $0x3cc] ss:$16 sps:$4 sm:$0xff]   ;;  %v2093_v0 = vld [vmem:[#allocation3 + $0x1c8] ss:$16 sps:$4 sm:$0xff]  }
  0x63   :  { %908 = vmatprep.subr.bf16.mxu1 %v2001_v1  ;;  %v2096_v1 = vld [vmem:[#allocation3 + $0x3c8] ss:$16 sps:$4 sm:$0xff]  }
  0x65   :  { %868 = vmatpush1.bf16.msra.mxu0 %v2003_v2  ;;  %v2101_v2 = vld [vmem:[#allocation3 + $0x1ec] ss:$16 sps:$4 sm:$0xff]  }
  0x66   :  { %909 = vmatpush1.bf16.msra.mxu1 %v2004_v3  ;;  %919 = vmatprep.subr.bf16.mxu0 %v2011_v4  ;;  %v2104_v3 = vld [vmem:[#allocation3 + $0x3ec] ss:$16 sps:$4 sm:$0xff]   ;;  %v2099_v4 = vld [vmem:[#allocation3 + $0x1e8] ss:$16 sps:$4 sm:$0xff]  }
  0x67   :  { %960 = vmatprep.subr.bf16.mxu1 %v2014_v5  ;;  %v2102_v5 = vld [vmem:[#allocation3 + $0x3e8] ss:$16 sps:$4 sm:$0xff]  }
  0x68   :  { %870 = vmatmul.mubr.bf16.vlgmr.msra.gmra.mrb[0].mxu0 %v2298_v6 }
  0x69   :  { %911 = vmatmul.mubr.bf16.vlgmr.msra.gmra.mrb[0].mxu1 %v2300_v7  ;;  %920 = vmatpush1.bf16.msra.mxu0 %v2009_v8  ;;  %v2105_v8 = vld [vmem:[#allocation6 + $0x40] sm:$0xff]  }
  0x6a   :  { %961 = vmatpush1.bf16.msra.mxu1 %v2012_v9  ;;  %921 = vmatprep.subr.bf16.mxu0 %v2017_v10  ;;  %v2106_v9 = vld [vmem:[#allocation6] sm:$0xff]   ;;  %v2107_v10 = vld [vmem:[#allocation6 + $0x48] sm:$0xff]  }
  0x6b   :  { %962 = vmatprep.subr.bf16.mxu1 %v2020_v11  ;;  %951 = vmatprep.mubr.bf16.mxu0 %v2292_v47  ;;  %v2074_v47 = vld [vmem:[#allocation3 + $0x34c] ss:$16 sps:$4 sm:$0xff]  }
  0x6c   :  { %992 = vmatprep.mubr.bf16.mxu1 %v1633_v51  ;;  %v2080_v51 = vld [vmem:[#allocation3 + $0x36c] ss:$16 sps:$4 sm:$0xff]  }
  0x6d   :  { %922 = vmatpush1.bf16.msra.mxu0 %v2015_v12  ;;  %v2108_v11 = vld [vmem:[#allocation6 + $0x8] sm:$0xff]   ;;  %v2109_v12 = vld [vmem:[#allocation6 + $0x50] sm:$0xff]  }
  0x6e   :  { %963 = vmatpush1.bf16.msra.mxu1 %v2018_v13  ;;  %923 = vmatprep.subr.bf16.mxu0 %v2023_v14  ;;  %v2110_v13 = vld [vmem:[#allocation6 + $0x10] sm:$0xff]   ;;  %v2111_v14 = vld [vmem:[#allocation6 + $0x58] sm:$0xff]  }
  0x6f   :  { %964 = vmatprep.subr.bf16.mxu1 %v2026_v15  ;;  %v2112_v15 = vld [vmem:[#allocation6 + $0x18] sm:$0xff]  }
  0x71   :  { %924 = vmatpush1.bf16.msra.mxu0 %v2021_v16  ;;  %v2113_v16 = vld [vmem:[#allocation6 + $0x60] sm:$0xff]  }
  0x72   :  { %965 = vmatpush1.bf16.msra.mxu1 %v2024_v17  ;;  %925 = vmatprep.subr.bf16.mxu0 %v2029_v18  ;;  %v2114_v17 = vld [vmem:[#allocation6 + $0x20] sm:$0xff]   ;;  %v2115_v18 = vld [vmem:[#allocation6 + $0x68] sm:$0xff]  }
  0x73   :  { %966 = vmatprep.subr.bf16.mxu1 %v2032_v19  ;;  %v2118_v19 = vld [vmem:[#allocation6 + $0x30] sm:$0xff]  }
  0x75   :  { %926 = vmatpush1.bf16.msra.mxu0 %v2027_v20  ;;  %v2119_v20 = vld [vmem:[#allocation6 + $0x78] sm:$0xff]  }
  0x76   :  { %967 = vmatpush1.bf16.msra.mxu1 %v2030_v21  ;;  %927 = vmatprep.subr.bf16.mxu0 %v2035_v22  ;;  %v2120_v21 = vld [vmem:[#allocation6 + $0x38] sm:$0xff]   ;;  %v2121_v22 = vld [vmem:[#allocation6 + $0xc0] sm:$0xff]  }
  0x77   :  { %968 = vmatprep.subr.bf16.mxu1 %v2038_v23  ;;  %v2122_v23 = vld [vmem:[#allocation6 + $0x80] sm:$0xff]  }
  0x79   :  { %928 = vmatpush1.bf16.msra.mxu0 %v2033_v24  ;;  %v2123_v24 = vld [vmem:[#allocation6 + $0xc8] sm:$0xff]  }
  0x7a   :  { %969 = vmatpush1.bf16.msra.mxu1 %v2036_v25  ;;  %929 = vmatprep.subr.bf16.mxu0 %v2041_v26  ;;  %v2124_v25 = vld [vmem:[#allocation6 + $0x88] sm:$0xff]   ;;  %v2125_v26 = vld [vmem:[#allocation6 + $0xd0] sm:$0xff]  }
  0x7b   :  { %970 = vmatprep.subr.bf16.mxu1 %v2044_v27  ;;  %v2126_v27 = vld [vmem:[#allocation6 + $0x90] sm:$0xff]  }
  0x7d   :  { %930 = vmatpush1.bf16.msra.mxu0 %v2039_v28  ;;  %v2127_v28 = vld [vmem:[#allocation6 + $0xd8] sm:$0xff]  }
  0x7e   :  { %971 = vmatpush1.bf16.msra.mxu1 %v2042_v29  ;;  %931 = vmatprep.subr.bf16.mxu0 %v2047_v30  ;;  %v2128_v29 = vld [vmem:[#allocation6 + $0x98] sm:$0xff]   ;;  %v2129_v30 = vld [vmem:[#allocation6 + $0xe0] sm:$0xff]  }
  0x7f   :  { %972 = vmatprep.subr.bf16.mxu1 %v2050_v31  ;;  %v2130_v31 = vld [vmem:[#allocation6 + $0xa0] sm:$0xff]  }
  0x81   :  { %932 = vmatpush1.bf16.msra.mxu0 %v2045_v32  ;;  %v2131_v32 = vld [vmem:[#allocation6 + $0xe8] sm:$0xff]  }
  0x82   :  { %973 = vmatpush1.bf16.msra.mxu1 %v2048_v33  ;;  %933 = vmatprep.subr.bf16.mxu0 %v2053_v34  ;;  %v2132_v33 = vld [vmem:[#allocation6 + $0xa8] sm:$0xff]   ;;  %v2133_v34 = vld [vmem:[#allocation6 + $0xf0] sm:$0xff]  }
  0x83   :  { %974 = vmatprep.subr.bf16.mxu1 %v2056_v35  ;;  %v2134_v35 = vld [vmem:[#allocation6 + $0xb0] sm:$0xff]  }
  0x85   :  { %934 = vmatpush1.bf16.msra.mxu0 %v2051_v36  ;;  %v2135_v36 = vld [vmem:[#allocation6 + $0xf8] sm:$0xff]  }
  0x86   :  { %975 = vmatpush1.bf16.msra.mxu1 %v2054_v37  ;;  %935 = vmatprep.subr.bf16.mxu0 %v2059_v38  ;;  %v2136_v37 = vld [vmem:[#allocation6 + $0xb8] sm:$0xff]   ;;  %v1034_v38 = vlaneseq }
  0x87   :  { %976 = vmatprep.subr.bf16.mxu1 %v2062_v39 }
  0x88   :  { %v1035_v39 = vshrl.u32 %v1034_v38, 7 }
  0x89   :  { %936 = vmatpush1.bf16.msra.mxu0 %v2057_v40 }
  0x8a   :  { %977 = vmatpush1.bf16.msra.mxu1 %v2060_v41  ;;  %937 = vmatprep.subr.bf16.mxu0 %v2065_v42  ;;  %v1036_v40 = vsub.s32 0, %v1035_v39  ;;  %v1032_v41 = vld [vmem:[%s2372_s5] ss:$4 sm:$0xf]  ;;  %v1040_v42 = vsub.s32 1, %v1035_v39 }
  0x8b   :  { %978 = vmatprep.subr.bf16.mxu1 %v2068_v43 }
  0x8c   :  { %v1037_v43 = vrot.slane %v1032_v41, %v1036_v40 }
  0x8d   :  { %938 = vmatpush1.bf16.msra.mxu0 %v2063_v44 }
  0x8e   :  { %979 = vmatpush1.bf16.msra.mxu1 %v2066_v45  ;;  %939 = vmatprep.subr.bf16.mxu0 %v2071_v46  ;;  %v1041_v46 = vrot.slane %v1032_v41, %v1040_v42 }
  0x8f   :  { %980 = vmatprep.subr.bf16.mxu1 %v2074_v47 }
  0x91   :  { %940 = vmatpush1.bf16.msra.mxu0 %v2069_v48 }
  0x92   :  { %981 = vmatpush1.bf16.msra.mxu1 %v2072_v49  ;;  %941 = vmatprep.subr.bf16.mxu0 %v2077_v50 }
  0x93   :  { %982 = vmatprep.subr.bf16.mxu1 %v2080_v51 }
  0x95   :  { %942 = vmatpush1.bf16.msra.mxu0 %v2075_v52 }
  0x96   :  { %983 = vmatpush1.bf16.msra.mxu1 %v2078_v53  ;;  %943 = vmatprep.subr.bf16.mxu0 %v2083_v54 }
  0x97   :  { %984 = vmatprep.subr.bf16.mxu1 %v2086_v55 }
  0x99   :  { %944 = vmatpush1.bf16.msra.mxu0 %v2081_v56 }
  0x9a   :  { %985 = vmatpush1.bf16.msra.mxu1 %v2084_v57  ;;  %945 = vmatprep.subr.bf16.mxu0 %v2089_v58 }
  0x9b   :  { %986 = vmatprep.subr.bf16.mxu1 %v2092_v59 }
  0x9d   :  { %946 = vmatpush1.bf16.msra.mxu0 %v2087_v60 }
  0x9e   :  { %987 = vmatpush1.bf16.msra.mxu1 %v2090_v61  ;;  %947 = vmatprep.subr.bf16.mxu0 %v2095_v62 }
  0x9f   :  { %988 = vmatprep.subr.bf16.mxu1 %v2098_v63  ;;  %v1044_v63 = vsub.s32 2, %v1035_v39 }
  0xa1   :  { %948 = vmatpush1.bf16.msra.mxu0 %v2093_v0  ;;  %v1048_v0 = vsub.s32 3, %v1035_v39 }
  0xa2   :  { %989 = vmatpush1.bf16.msra.mxu1 %v2096_v1  ;;  %949 = vmatprep.subr.bf16.mxu0 %v2101_v2  ;;  %v1045_v1 = vrot.slane %v1032_v41, %v1044_v63 }
  0xa3   :  { %990 = vmatprep.subr.bf16.mxu1 %v2104_v3 }
  0xa5   :  { %950 = vmatpush1.bf16.msra.mxu0 %v2099_v4  ;;  %v1049_v4 = vrot.slane %v1032_v41, %v1048_v0 }
  0xa6   :  { %991 = vmatpush1.bf16.msra.mxu1 %v2102_v5  ;;  %1810 = vmatprep.subr.bf16.mxu0 %v2105_v8 }
  0xa7   :  { %1832 = vmatprep.subr.bf16.mxu1 %v2121_v22  ;;  %v2227_v22 = vmov 0.0  }
  0xa8   :  { %952 = vmatmul.mubr.bf16.vlgmr.msra.gmra.mrb[4].mxu0 %v2298_v6  ;;  %v2116_v6 = vld [vmem:[#allocation6 + $0x28] sm:$0xff]  }
  0xa9   :  { %993 = vmatmul.mubr.bf16.vlgmr.msra.gmra.mrb[4].mxu1 %v2300_v7  ;;  %1811 = vmatpush3.bf16.msra.mxu0 %v2106_v9  ;;  %v2117_v7 = vld [vmem:[#allocation6 + $0x70] sm:$0xff]  }
  0xaa   :  { %1812 = vmatprep.subr.bf16.mxu0 %v2107_v10  ;;  %1833 = vmatpush3.bf16.msra.mxu1 %v2122_v23  ;;  %v2138_v23 = vld [vmem:[%s2370_s3 + $0x8] sm:$0xff]  }
  0xab   :  { %1834 = vmatprep.subr.bf16.mxu1 %v2123_v24  ;;  %v2139_v24 = vld [vmem:[%s2370_s3 + $0x10] sm:$0xff]  }
  0xad   :  { %1813 = vmatpush3.bf16.msra.mxu0 %v2108_v11 }
  0xae   :  { %1814 = vmatprep.subr.bf16.mxu0 %v2109_v12  ;;  %1835 = vmatpush3.bf16.msra.mxu1 %v2124_v25  ;;  %v2140_v25 = vld [vmem:[%s2370_s3 + $0x18] sm:$0xff]  }
  0xaf   :  { %1836 = vmatprep.subr.bf16.mxu1 %v2125_v26  ;;  %v2141_v26 = vld [vmem:[%s2370_s3 + $0x20] sm:$0xff]  }
  0xb1   :  { %1815 = vmatpush3.bf16.msra.mxu0 %v2110_v13 }
  0xb2   :  { %1816 = vmatprep.subr.bf16.mxu0 %v2111_v14  ;;  %1837 = vmatpush3.bf16.msra.mxu1 %v2126_v27  ;;  %v2142_v27 = vld [vmem:[%s2370_s3 + $0x28] sm:$0xff]  }
  0xb3   :  { %1838 = vmatprep.subr.bf16.mxu1 %v2127_v28  ;;  %v2143_v28 = vld [vmem:[%s2370_s3 + $0x30] sm:$0xff]  }
  0xb5   :  { %1817 = vmatpush3.bf16.msra.mxu0 %v2112_v15 }
  0xb6   :  { %1818 = vmatprep.subr.bf16.mxu0 %v2113_v16  ;;  %1839 = vmatpush3.bf16.msra.mxu1 %v2128_v29  ;;  %v2144_v29 = vld [vmem:[%s2370_s3 + $0x38] sm:$0xff]  }
  0xb7   :  { %1840 = vmatprep.subr.bf16.mxu1 %v2129_v30  ;;  %v2145_v30 = vld [vmem:[%s2371_s4] sm:$0xff]  }
  0xb9   :  { %1819 = vmatpush3.bf16.msra.mxu0 %v2114_v17 }
  0xba   :  { %1820 = vmatprep.subr.bf16.mxu0 %v2115_v18  ;;  %1841 = vmatpush3.bf16.msra.mxu1 %v2130_v31  ;;  %v2146_v31 = vld [vmem:[%s2371_s4 + $0x8] sm:$0xff]  }
  0xbb   :  { %1842 = vmatprep.subr.bf16.mxu1 %v2131_v32 }
  0xbd   :  { %1821 = vmatpush3.bf16.msra.mxu0 %v2116_v6 }
  0xbe   :  { %1822 = vmatprep.subr.bf16.mxu0 %v2117_v7  ;;  %1843 = vmatpush3.bf16.msra.mxu1 %v2132_v33 }
  0xbf   :  { %1844 = vmatprep.subr.bf16.mxu1 %v2133_v34 }
  0xc1   :  { %1823 = vmatpush3.bf16.msra.mxu0 %v2118_v19 }
  0xc2   :  { %1824 = vmatprep.subr.bf16.mxu0 %v2119_v20  ;;  %1845 = vmatpush3.bf16.msra.mxu1 %v2134_v35 }
  0xc3   :  { %1846 = vmatprep.subr.bf16.mxu1 %v2135_v36 }
  0xc5   :  { %1825 = vmatpush3.bf16.msra.mxu0 %v2120_v21  ;;  %v2137_v21 = vld [vmem:[%s2370_s3] sm:$0xff]  }
  0xc6   :  { %1847 = vmatpush3.bf16.msra.mxu1 %v2136_v37  ;;  %1868 = vmatprep.subr.bf16.mxu0 %v2227_v22  ;;  %v1762_v37 = vld [vmem:[%s2372_s5 + $0x1] ss:$0 sm:$0xff] }
  0xc7   :  { %1888 = vmatprep.subr.bf16.mxu1 %v2227_v22 }
 0x13b   :  { %v871_v44 = vpop.f32.mrb[0].mxu0 }
 0x13c   :  { %v912_v45 = vpop.f32.mrb[0].mxu1  ;;  %v873_v48 = vpop.f32.mrb[1].mxu0 }
 0x13d   :  { %v913_v47 = vadd.f32 %v912_v45, %v871_v44  ;;  %v914_v49 = vpop.f32.mrb[1].mxu1  ;;  %v875_v51 = vpop.f32.mrb[2].mxu0 }
 0x13e   :  { %v915_v50 = vadd.f32 %v914_v49, %v873_v48  ;;  %v916_v52 = vpop.f32.mrb[2].mxu1  ;;  %v876_v54 = vpop.f32.mrb[3].mxu0  ;;  %v2147_v48 = vld [vmem:[%s2371_s4 + $0x10] sm:$0xff]   ;;  %v2148_v49 = vld [vmem:[%s2371_s4 + $0x18] sm:$0xff]   ;;  %s2229_s4 = smov [#allocation8]  }
 0x13f   :  { %v1054_v53 = vadd.f32 %v1037_v43, %v913_v47  ;;  %v917_v55 = vpop.f32.mrb[3].mxu1  ;;  %s1620_s30 = sshll.u32 %s2229_s4, 4  ;;  %s1621_s30 = int_to_ptr.vmem [resolvable:$true] %s1620_s30 }
 0x140   :  { %v1055_v56 = vadd.f32 %v1041_v46, %v915_v50  ;;  %v1795_v50 = vld [vmem:[%s2372_s5 + $0x2] ss:$0 sm:$0xff]  ;;  %s2193_s7 = scalar_lea.vmem %s1621_s30, 128  ;;  %p2198_p3 = scmp.lt.s32.totalorder %s1621_s30, %s1621_s30 }
 0x141   :  { %vm1058_vm0 = vcmp.gt.f32.partialorder %v1054_v53, 0.0  ;;  %v1062_v57 = vmul.f32 0.1, %v1054_v53  ;;  %p2194_p2 = scmp.ne.s32.totalorder %s1621_s30, %s2193_s7  ;;  %p2199_p4 = scmp.lt.s32.totalorder %s2193_s7, %s2193_s7 }
 0x142   :  { %v1063_v58 = vmul.f32 0.1, %v1055_v56  ;;  %vm1059_vm1 = vcmp.gt.f32.partialorder %v1055_v56, 0.0 }
 0x143   :  { %v1066_v59 = vsel %vm1058_vm0, %v1054_v53, %v1062_v57  ;;  %p2200_p5 = por %p2199_p4, %p2198_p3 }
 0x144   :  { %v1067_v60 = vsel %vm1059_vm1, %v1055_v56, %v1063_v58  ;;  %v1070_v62 = vpack.c.bf16 %v1066_v59, %v1066_v59  ;;  %v1804_v59 = vld [vmem:[%s2372_s5 + $0x3] ss:$0 sm:$0xff] }
 0x145   :  { %v1071_v61 = vpack.c.bf16 %v1067_v60, %v1067_v60  ;;  %p2201_p6 = pnand %p2200_p5, %p2194_p2 }
 0x147   :  { %1367 = vmatprep.mubr.bf16.mxu0 %v1071_v61 }
 0x148   :  { %1368 = vmatmul.mubr.bf16.vlgmr.msra.gmra.mrb[8].mxu0 %v1070_v62 }
 0x149   :  { %1869 = vmatpush3.bf16.msra.mxu0 %v2137_v21  ;;  %1884 = vmatprep.mubr.msk.bf16.mxu0 %vm2228_vm4, %v2227_v22 }
 0x14a   :  { %1870 = vmatprep.subr.bf16.mxu0 %v2227_v22 }
 0x14d   :  { %1871 = vmatpush3.bf16.msra.mxu0 %v2138_v23 }
 0x14e   :  { %1872 = vmatprep.subr.bf16.mxu0 %v2227_v22 }
 0x151   :  { %1873 = vmatpush3.bf16.msra.mxu0 %v2139_v24 }
 0x152   :  { %1874 = vmatprep.subr.bf16.mxu0 %v2227_v22 }
 0x155   :  { %1875 = vmatpush3.bf16.msra.mxu0 %v2140_v25 }
 0x156   :  { %1876 = vmatprep.subr.bf16.mxu0 %v2227_v22 }
 0x159   :  { %1877 = vmatpush3.bf16.msra.mxu0 %v2141_v26 }
 0x15a   :  { %1878 = vmatprep.subr.bf16.mxu0 %v2227_v22 }
 0x15d   :  { %1879 = vmatpush3.bf16.msra.mxu0 %v2142_v27 }
 0x15e   :  { %1880 = vmatprep.subr.bf16.mxu0 %v2227_v22 }
 0x161   :  { %1881 = vmatpush3.bf16.msra.mxu0 %v2143_v28 }
 0x162   :  { %1882 = vmatprep.subr.bf16.mxu0 %v2227_v22 }
 0x165   :  { %1883 = vmatpush3.bf16.msra.mxu0 %v2144_v29 }
 0x17b   :  { %v953_v2 = vpop.f32.mrb[4].mxu0 }
 0x17c   :  { %v994_v3 = vpop.f32.mrb[4].mxu1  ;;  %v955_v8 = vpop.f32.mrb[5].mxu0 }
 0x17d   :  { %v995_v5 = vadd.f32 %v994_v3, %v953_v2  ;;  %v996_v9 = vpop.f32.mrb[5].mxu1  ;;  %v957_v11 = vpop.f32.mrb[6].mxu0 }
 0x17e   :  { %v997_v10 = vadd.f32 %v996_v9, %v955_v8  ;;  %v998_v12 = vpop.f32.mrb[6].mxu1  ;;  %v958_v14 = vpop.f32.mrb[7].mxu0 }
 0x17f   :  { %v1056_v13 = vadd.f32 %v1045_v1, %v995_v5  ;;  %v999_v15 = vpop.f32.mrb[7].mxu1 }
 0x180   :  { %v1057_v16 = vadd.f32 %v1049_v4, %v997_v10 }
 0x181   :  { %vm1060_vm2 = vcmp.gt.f32.partialorder %v1056_v13, 0.0  ;;  %v1064_v17 = vmul.f32 0.1, %v1056_v13 }
 0x182   :  { %v1065_v18 = vmul.f32 0.1, %v1057_v16  ;;  %vm1061_vm3 = vcmp.gt.f32.partialorder %v1057_v16, 0.0 }
 0x183   :  { %v1068_v6 = vsel %vm1060_vm2, %v1056_v13, %v1064_v17 }
 0x184   :  { %v1069_v7 = vsel %vm1061_vm3, %v1057_v16, %v1065_v18  ;;  %v1072_v20 = vpack.c.bf16 %v1068_v6, %v1068_v6 }
 0x185   :  { %v1073_v19 = vpack.c.bf16 %v1069_v7, %v1069_v7 }
 0x187   :  { %1407 = vmatprep.mubr.bf16.mxu1 %v1073_v19 }
 0x188   :  { %1408 = vmatmul.mubr.bf16.vlgmr.msra.gmra.mrb[8].mxu1 %v1072_v20 }
 0x189   :  { %1896 = vmatprep.mubr.msk.bf16.mxu1 %vm2228_vm4, %v2227_v22  ;;  %1889 = vmatpush3.bf16.msra.mxu1 %v2145_v30 }
 0x18a   :  { %1890 = vmatprep.subr.bf16.mxu1 %v2227_v22 }
 0x18d   :  { %1891 = vmatpush3.bf16.msra.mxu1 %v2146_v31 }
 0x18e   :  { %1892 = vmatprep.subr.bf16.mxu1 %v2227_v22 }
 0x191   :  { %1893 = vmatpush3.bf16.msra.mxu1 %v2147_v48 }
 0x192   :  { %1894 = vmatprep.subr.bf16.mxu1 %v2227_v22 }
 0x195   :  { %1895 = vmatpush3.bf16.msra.mxu1 %v2148_v49 }
 0x21b   :  { %v1826_v32 = vpop.f32.mrb[8].mxu0 }
 0x21c   :  { %v1827_v33 = vpop.f32.mrb[9].mxu0 }
 0x21d   :  { %v1828_v34 = vadd.f32 %v1827_v33, %v1826_v32  ;;  %v1829_v35 = vpop.f32.mrb[10].mxu0 }
 0x21e   :  { %v1830_v36 = vpop.f32.mrb[11].mxu0 }
 0x21f   :  { %v1370_v40 = vadd.f32 %v1828_v34, %v1762_v37 }
 0x25b   :  { %v1848_v38 = vpop.f32.mrb[8].mxu1 }
 0x25c   :  { %v1849_v39 = vpop.f32.mrb[9].mxu1 }
 0x25d   :  { %v1850_v41 = vadd.f32 %v1849_v39, %v1848_v38  ;;  %v1851_v42 = vpop.f32.mrb[10].mxu1 }
 0x25e   :  { %v1852_v43 = vpop.f32.mrb[11].mxu1 }
 0x25f   :  { %v1410_v44 = vadd.f32 %v1850_v41, %v1370_v40 }
 0x261   :  { %vm1415_vm5 = vcmp.gt.f32.partialorder %v1410_v44, 0.0  ;;  %v1416_v45 = vmul.f32 0.1, %v1410_v44 }
 0x263   :  { %v1417_v46 = vsel %vm1415_vm5, %v1410_v44, %v1416_v45 }
 0x264   :  { %v1418_v47 = vpack.c.bf16 %v1417_v46, %v1417_v46 }
 0x266   :  { %1885 = vmatmul.mubr.bf16.vlgmr.msra.gmra.mrb[12].mxu0 %v1418_v47 }
 0x339   :  { %v1522_v51 = vpop.f32.mrb[12].mxu0 }
 0x33a   :  { %v1523_v52 = vadd.f32 %v1795_v50, %v1522_v51  ;;  %v1886_v53 = vpop.f32.mrb[13].mxu0 }
 0x33b   :  { %v1525_v54 = vpop.f32.mrb[14].mxu0 }
 0x33c   :  { %vm1528_vm6 = vcmp.gt.f32.partialorder %v1523_v52, 0.0  ;;  %v1529_v55 = vmul.f32 0.1, %v1523_v52  ;;  %v1887_v56 = vpop.f32.mrb[15].mxu0 }
 0x33e   :  { %v1530_v57 = vsel %vm1528_vm6, %v1523_v52, %v1529_v55 }
 0x33f   :  { %v1531_v58 = vpack.c.bf16 %v1530_v57, %v1530_v57 }
 0x341   :  { %1897 = vmatmul.mubr.msk.bf16.vlgmr.msra.gmra.mrb[12].mxu1 %vm1569_vm7, %v1531_v58 }
 0x414   :  { %v1607_v60 = vpop.f32.mrb[12].mxu1 }
 0x415   :  { %v1608_v61 = vadd.f32 %v1804_v59, %v1607_v60  ;;  %v1898_v62 = vpop.f32.mrb[13].mxu1 }
 0x416   :  { %v1610_v63 = vpop.f32.mrb[14].mxu1 }
 0x417   :  { %1613 = vst [vmem:[#allocation8] sm:$0xff] %v1608_v61  ;;  %v1899_v0 = vpop.f32.mrb[15].mxu1 }
 0x418   :  { %2204 = shalt.err (!%p2201_p6)
}
 0x419   :  { %s2205_s5 = scalar_lea.hbm %s2373_s6, 128 }
 0x41a   :  { %p2206_p7 = scmp.ne.s32.totalorder %s2373_s6, %s2205_s5  ;;  %p2209_p8 = scmp.lt.u32.totalorder %s2205_s5, %s2373_s6 }
 0x41c   :  { %p2211_p9 = pnand %p2209_p8, %p2206_p7 }
 0x41e   :  { %2214 = shalt.err (!%p2211_p9)
}
 0x41f   :  { %1623 = dma.vmem_to_hbm [thread:$0]  %s1621_s30, 128, %s2373_s6, [#allocation5]  }
 0x420   :  { %2219 = dma.done.wait [#allocation5], 128  }
 0x421   :  { %2220 = vsyncadd [#allocation5], 4294967168 }
 0x422   :  { %1627 = vsyncpa [#allocation4], 1 }
 0x423   :  { %1628 = vsyncpa [#allocation7], 1 }
 0x424   :  { %1629 = vsyncpa [#allocation5], 1 }

</bundles_post_ra>
